<compile_context>
chip_gen: v7x
topology: tpu7x:2x2x1
jax: 0.10.0
libtpu: 0.0.40
codegen_flags: <defaults>
</compile_context>

<pallas_src>
import jax
import jax.numpy as jnp
from jax import lax
from jax.experimental import pallas as pl
from jax.experimental.pallas import tpu as pltpu


# ----------------------------- Pallas kernels -------------------------------

def _gemm_relu_kernel(x_ref, w_ref, o_ref):
    """conv1 as one big-K GEMM per row tile, ReLU fused into the epilogue."""
    acc = jnp.dot(x_ref[...], w_ref[...], preferred_element_type=jnp.float32)
    o_ref[...] = jnp.maximum(acc, 0.0).astype(o_ref.dtype)


def _gemm_bn_relu_kernel(x_ref, w_ref, scale_ref, bias_ref, o_ref):
    """conv2 as one big-K GEMM per row tile, folded BN + ReLU epilogue."""
    acc = jnp.dot(x_ref[...], w_ref[...], preferred_element_type=jnp.float32)
    y = acc * scale_ref[...] + bias_ref[...]
    o_ref[...] = jnp.maximum(y, 0.0).astype(o_ref.dtype)


# ------------------------------ launchers -----------------------------------

_VMEM_LIMIT = 32 * 1024 * 1024  # explicit budget; safe on v5e/v6e/v7x


def _gemm_relu(lhs, w, out_dtype, tm):
    mp, k = lhs.shape
    cout = w.shape[1]
    assert mp % tm == 0, (mp, tm)
    bytes_accessed = (lhs.size * lhs.dtype.itemsize + w.size * w.dtype.itemsize
                      + mp * cout * jnp.dtype(out_dtype).itemsize)
    return pl.pallas_call(
        _gemm_relu_kernel,
        out_shape=jax.ShapeDtypeStruct((mp, cout), out_dtype),
        grid_spec=pltpu.PrefetchScalarGridSpec(
            num_scalar_prefetch=0,
            grid=(mp // tm,),
            in_specs=[
                pl.BlockSpec((tm, k), lambda m: (m, 0)),
                pl.BlockSpec((k, cout), lambda m: (0, 0)),   # VMEM-resident
            ],
            out_specs=pl.BlockSpec((tm, cout), lambda m: (m, 0)),
        ),
        compiler_params=pltpu.CompilerParams(
            dimension_semantics=("parallel",),
            vmem_limit_bytes=_VMEM_LIMIT),
        cost_estimate=pl.CostEstimate(
            flops=2 * mp * k * cout, transcendentals=0,
            bytes_accessed=int(bytes_accessed)),
    )(lhs, w)


def _gemm_bn_relu(lhs, w, scale, bias, out_dtype, tm):
    mp, k = lhs.shape
    cout = w.shape[1]
    assert mp % tm == 0, (mp, tm)
    bytes_accessed = (lhs.size * lhs.dtype.itemsize + w.size * w.dtype.itemsize
                      + mp * cout * jnp.dtype(out_dtype).itemsize)
    return pl.pallas_call(
        _gemm_bn_relu_kernel,
        out_shape=jax.ShapeDtypeStruct((mp, cout), out_dtype),
        grid_spec=pltpu.PrefetchScalarGridSpec(
            num_scalar_prefetch=0,
            grid=(mp // tm,),
            in_specs=[
                pl.BlockSpec((tm, k), lambda m: (m, 0)),
                pl.BlockSpec((k, cout), lambda m: (0, 0)),   # VMEM-resident
                pl.BlockSpec((1, cout), lambda m: (0, 0)),   # folded BN scale
                pl.BlockSpec((1, cout), lambda m: (0, 0)),   # folded BN bias
            ],
            out_specs=pl.BlockSpec((tm, cout), lambda m: (m, 0)),
        ),
        compiler_params=pltpu.CompilerParams(
            dimension_semantics=("parallel",),
            vmem_limit_bytes=_VMEM_LIMIT),
        cost_estimate=pl.CostEstimate(
            flops=2 * mp * k * cout, transcendentals=0,
            bytes_accessed=int(bytes_accessed)),
    )(lhs, w, scale, bias)


# ------------------------------- wrapper -------------------------------------

def _round_up(n, m):
    return ((n + m - 1) // m) * m


def _tile_rows(m, target=512):
    """Row tile (multiple of 8) and padded row count.

    Prefers 512-row tiles; for mid-sized M splits into >=2 blocks so the
    'parallel' grid axis can be sharded across v7x's two TensorCores.
    """
    m8 = _round_up(m, 8)
    if m8 <= 256:
        return m8, m8
    if m8 <= target:
        tm = _round_up((m8 + 1) // 2, 8)
        return tm, 2 * tm
    return target, _round_up(m8, target)


def _pad_rows(a, mp):
    m = a.shape[0]
    if mp == m:
        return a
    return jnp.pad(a, ((0, mp - m), (0, 0)))


def _im2col(x_nhwc, ksize, stride, padding):
    """im2col operand (B*Ho*Wo, ksize*ksize*C).  Pure data movement.

    K ordering is (kh, kw, cin), matching transpose(w, (2,3,1,0)).reshape(K, Cout).
    """
    B, H, W, C = x_nhwc.shape
    xp = jnp.pad(x_nhwc,
                 ((0, 0), (padding, padding), (padding, padding), (0, 0)))
    Hp, Wp = H + 2 * padding, W + 2 * padding
    Ho = (Hp - ksize) // stride + 1
    Wo = (Wp - ksize) // stride + 1
    cols = []
    for kh in range(ksize):
        for kw in range(ksize):
            sl = lax.slice(
                xp,
                (0, kh, kw, 0),
                (B, kh + stride * (Ho - 1) + 1, kw + stride * (Wo - 1) + 1, C),
                (1, stride, stride, 1))
            cols.append(sl.reshape(B * Ho * Wo, C))
    return jnp.concatenate(cols, axis=-1), (B, Ho, Wo)


def conv2x_forward(x, rem, params, eps=1e-5):
    """Conv2x forward (deconv=False, concat=True, bn=True, relu=True).

    x   : (B, C_in, H, W)        NCHW, like PyTorch
    rem : (B, C_out, H/2, W/2)
    params: w1 (C_out, C_in, 3, 3), w2 (C_out, 2*C_out, 3, 3),
            gamma/beta/running_mean/running_var: (C_out,)
    returns (B, C_out, H/2, W/2)
    """
    w1, w2 = params["w1"], params["w2"]
    cout, cin = w1.shape[0], w1.shape[1]
    cdtype = jnp.bfloat16  # MXU-native operand dtype; accumulation stays f32

    # NCHW -> NHWC so channels land on the 128-lane axis; bf16 operands.
    x_nhwc = jnp.transpose(x, (0, 2, 3, 1)).astype(cdtype)
    rem_nhwc = jnp.transpose(rem, (0, 2, 3, 1)).astype(cdtype)

    # ---- conv1: 3x3, stride 2, pad 1, ReLU (no BN) --------------------------
    cols1, (B, Ho, Wo) = _im2col(x_nhwc, ksize=3, stride=2, padding=1)
    M = B * Ho * Wo
    tm, Mp = _tile_rows(M)
    cols1 = _pad_rows(cols1, Mp)
    w1m = jnp.transpose(w1, (2, 3, 1, 0)).reshape(9 * cin, cout).astype(cdtype)
    y1_flat = _gemm_relu(cols1, w1m, cdtype, tm)[:M]          # (M, C_out) bf16
    y1 = y1_flat.reshape(B, Ho, Wo, cout)

    assert rem_nhwc.shape == y1.shape, (rem_nhwc.shape, y1.shape)

    # ---- concat + conv2: 3x3, stride 1, pad 1, BN, ReLU ---------------------
    # Concat once in NHWC (cheap), then a single K = 9*2*C_out GEMM.
    z = jnp.concatenate([y1, rem_nhwc], axis=-1)              # (B,Ho,Wo,2C)
    cols2, _ = _im2col(z, ksize=3, stride=1, padding=1)
    cols2 = _pad_rows(cols2, Mp)
    w2m = jnp.transpose(w2, (2, 3, 1, 0)).reshape(9 * 2 * cout, cout)
    w2m = w2m.astype(cdtype)

    # Fold inference-mode BatchNorm into per-channel scale/bias epilogue.
    inv_std = 1.0 / jnp.sqrt(params["running_var"].astype(jnp.float32) + eps)
    scale = (params["gamma"] * inv_std).reshape(1, cout).astype(jnp.float32)
    bias = (params["beta"] - params["running_mean"] * params["gamma"] * inv_std)
    bias = bias.reshape(1, cout).astype(jnp.float32)

    y2_flat = _gemm_bn_relu(cols2, w2m, scale, bias, x.dtype, tm)[:M]
    y2 = y2_flat.reshape(B, Ho, Wo, cout)
    return jnp.transpose(y2, (0, 3, 1, 2))                    # back to NCHW


# ------------------------------ reference ------------------------------------

def _reference(x, rem, params, eps=1e-5):
    w1, w2 = params["w1"], params["w2"]
    y = lax.conv_general_dilated(
        x, w1, window_strides=(2, 2), padding=((1, 1), (1, 1)),
        dimension_numbers=("NCHW", "OIHW", "NCHW"))
    y = jnp.maximum(y, 0.0)
    z = jnp.concatenate([y, rem], axis=1)
    z = lax.conv_general_dilated(
        z, w2, window_strides=(1, 1), padding=((1, 1), (1, 1)),
        dimension_numbers=("NCHW", "OIHW", "NCHW"))
    g = params["gamma"][None, :, None, None]
    b = params["beta"][None, :, None, None]
    m = params["running_mean"][None, :, None, None]
    v = params["running_var"][None, :, None, None]
    z = (z - m) / jnp.sqrt(v + eps) * g + b
    return jnp.maximum(z, 0.0)


def _bf16_exact(a):
    # Round test data to bf16-representable f32 values so the kernel's bf16
    # operands are exact and only MXU/bf16-intermediate rounding remains.
    return a.astype(jnp.bfloat16).astype(jnp.float32)


if __name__ == "__main__":
    key = jax.random.PRNGKey(0)
    B, Cin, Cout, H, W = 2, 64, 128, 16, 16
    Ho, Wo = H // 2, W // 2

    ks = jax.random.split(key, 8)
    x = _bf16_exact(jax.random.normal(ks[0], (B, Cin, H, W), jnp.float32))
    rem = _bf16_exact(jax.random.normal(ks[1], (B, Cout, Ho, Wo), jnp.float32))
    params = dict(
        w1=_bf16_exact(jax.random.normal(ks[2], (Cout, Cin, 3, 3),
                                         jnp.float32) * 0.05),
        w2=_bf16_exact(jax.random.normal(ks[3], (Cout, 2 * Cout, 3, 3),
                                         jnp.float32) * 0.05),
        gamma=jax.random.uniform(ks[4], (Cout,), jnp.float32, 0.5, 1.5),
        beta=jax.random.normal(ks[5], (Cout,), jnp.float32) * 0.1,
        running_mean=jax.random.normal(ks[6], (Cout,), jnp.float32) * 0.1,
        running_var=jax.random.uniform(ks[7], (Cout,), jnp.float32, 0.5, 1.5),
    )

    fwd = jax.jit(conv2x_forward)
    out = fwd(x, rem, params)
    out = jax.block_until_ready(out)

    ref = _reference(x, rem, params)
    assert out.shape == (B, Cout, Ho, Wo), out.shape
    # Tolerance covers bf16 operands / bf16 conv1 intermediate vs XLA's f32
    # conv reference (MXU default precision is a bf16 pass anyway); real
    # layout/fusion bugs produce O(1) errors, far above this.
    err = float(jnp.max(jnp.abs(out - ref)))
    assert jnp.allclose(out, ref, atol=1e-1, rtol=1e-2), err

    print("KERNEL_OK")
</pallas_src>

<mosaic_0001>
module attributes {stable_mosaic.version = 11 : i64} {
  func.func @_gemm_relu_kernel(%arg0: i32, %arg1: memref<128x576xbf16, #tpu.memory_space<vmem>>, %arg2: memref<576x128xbf16, #tpu.memory_space<vmem>>, %arg3: memref<128x128xbf16, #tpu.memory_space<vmem>>) attributes {dimension_semantics = [#tpu.dimension_semantics<parallel>], iteration_bounds = array<i64: 1>, scalar_prefetch = 0 : i64, scratch_operands = 0 : i64, tpu.core_type = #tpu.core_type<tc>, window_params = [{transform_indices = @transform_0, window_bounds = array<i64: 128, 576>}, {pipeline_mode = #tpu.pipeline_mode<synchronous>, transform_indices = @transform_1, window_bounds = array<i64: 576, 128>}, {transform_indices = @transform_2, window_bounds = array<i64: 128, 128>}]} {
    %c0 = arith.constant 0 : index
    %c0_0 = arith.constant 0 : index
    %0 = vector.load %arg1[%c0, %c0_0] : memref<128x576xbf16, #tpu.memory_space<vmem>>, vector<128x576xbf16>
    %c0_1 = arith.constant 0 : index
    %c0_2 = arith.constant 0 : index
    %1 = vector.load %arg2[%c0_1, %c0_2] : memref<576x128xbf16, #tpu.memory_space<vmem>>, vector<576x128xbf16>
    %cst = arith.constant dense<0.000000e+00> : vector<128x128xf32>
    %2 = tpu.matmul %0, %1, %cst {dimension_numbers = #tpu.dot_dimension_numbers<[1], [0], [0], [1], [0, 0, 1, 1], [], []>} : vector<128x576xbf16>, vector<576x128xbf16>, vector<128x128xf32> -> vector<128x128xf32>
    %cst_3 = arith.constant 0.000000e+00 : f32
    %3 = vector.broadcast %cst_3 : f32 to vector<128x128xf32>
    %4 = arith.maximumf %2, %3 : vector<128x128xf32>
    %5 = arith.truncf %4 : vector<128x128xf32> to vector<128x128xbf16>
    %c0_4 = arith.constant 0 : index
    %c0_5 = arith.constant 0 : index
    %6 = vector.load %arg3[%c0_4, %c0_5] : memref<128x128xbf16, #tpu.memory_space<vmem>>, vector<128x128xbf16>
    tpu.vector_store %arg3[%c0_4, %c0_5], %5 {strides = array<i32>} : memref<128x128xbf16, #tpu.memory_space<vmem>>, vector<128x128xbf16>,
    return
  }
  func.func @transform_0(%arg0: i32) -> (i32, i32) {
    %c0_i32 = arith.constant 0 : i32
    %c0_i32_0 = arith.constant 0 : i32
    return %arg0, %c0_i32 : i32, i32
  }
  func.func @transform_1(%arg0: i32) -> (i32, i32) {
    %c0_i32 = arith.constant 0 : i32
    %c0_i32_0 = arith.constant 0 : i32
    %c0_i32_1 = arith.constant 0 : i32
    return %c0_i32, %c0_i32_0 : i32, i32
  }
  func.func @transform_2(%arg0: i32) -> (i32, i32) {
    %c0_i32 = arith.constant 0 : i32
    %c0_i32_0 = arith.constant 0 : i32
    return %arg0, %c0_i32 : i32, i32
  }
}

module attributes {stable_mosaic.version = 11 : i64} {
  func.func @_gemm_bn_relu_kernel(%arg0: i32, %arg1: memref<128x2304xbf16, #tpu.memory_space<vmem>>, %arg2: memref<2304x128xbf16, #tpu.memory_space<vmem>>, %arg3: memref<1x128xf32, #tpu.memory_space<vmem>>, %arg4: memref<1x128xf32, #tpu.memory_space<vmem>>, %arg5: memref<128x128xf32, #tpu.memory_space<vmem>>) attributes {dimension_semantics = [#tpu.dimension_semantics<parallel>], iteration_bounds = array<i64: 1>, scalar_prefetch = 0 : i64, scratch_operands = 0 : i64, tpu.core_type = #tpu.core_type<tc>, window_params = [{transform_indices = @transform_0, window_bounds = array<i64: 128, 2304>}, {pipeline_mode = #tpu.pipeline_mode<synchronous>, transform_indices = @transform_1, window_bounds = array<i64: 2304, 128>}, {pipeline_mode = #tpu.pipeline_mode<synchronous>, transform_indices = @transform_2, window_bounds = array<i64: 1, 128>}, {pipeline_mode = #tpu.pipeline_mode<synchronous>, transform_indices = @transform_3, window_bounds = array<i64: 1, 128>}, {transform_indices = @transform_4, window_bounds = array<i64: 128, 128>}]} {
    %c0 = arith.constant 0 : index
    %c0_0 = arith.constant 0 : index
    %0 = vector.load %arg1[%c0, %c0_0] : memref<128x2304xbf16, #tpu.memory_space<vmem>>, vector<128x2304xbf16>
    %c0_1 = arith.constant 0 : index
    %c0_2 = arith.constant 0 : index
    %1 = vector.load %arg2[%c0_1, %c0_2] : memref<2304x128xbf16, #tpu.memory_space<vmem>>, vector<2304x128xbf16>
    %cst = arith.constant dense<0.000000e+00> : vector<128x128xf32>
    %2 = tpu.matmul %0, %1, %cst {dimension_numbers = #tpu.dot_dimension_numbers<[1], [0], [0], [1], [0, 0, 1, 1], [], []>} : vector<128x2304xbf16>, vector<2304x128xbf16>, vector<128x128xf32> -> vector<128x128xf32>
    %c0_3 = arith.constant 0 : index
    %c0_4 = arith.constant 0 : index
    %3 = vector.load %arg3[%c0_3, %c0_4] : memref<1x128xf32, #tpu.memory_space<vmem>>, vector<1x128xf32>
    %4 = vector.broadcast %3 : vector<1x128xf32> to vector<128x128xf32>
    %5 = arith.mulf %2, %4 : vector<128x128xf32>
    %c0_5 = arith.constant 0 : index
    %c0_6 = arith.constant 0 : index
    %6 = vector.load %arg4[%c0_5, %c0_6] : memref<1x128xf32, #tpu.memory_space<vmem>>, vector<1x128xf32>
    %7 = vector.broadcast %6 : vector<1x128xf32> to vector<128x128xf32>
    %8 = arith.addf %5, %7 : vector<128x128xf32>
    %cst_7 = arith.constant 0.000000e+00 : f32
    %9 = vector.broadcast %cst_7 : f32 to vector<128x128xf32>
    %10 = arith.maximumf %8, %9 : vector<128x128xf32>
    %c0_8 = arith.constant 0 : index
    %c0_9 = arith.constant 0 : index
    %11 = vector.load %arg5[%c0_8, %c0_9] : memref<128x128xf32, #tpu.memory_space<vmem>>, vector<128x128xf32>
    tpu.vector_store %arg5[%c0_8, %c0_9], %10 {strides = array<i32>} : memref<128x128xf32, #tpu.memory_space<vmem>>, vector<128x128xf32>,
    return
  }
  func.func @transform_0(%arg0: i32) -> (i32, i32) {
    %c0_i32 = arith.constant 0 : i32
    %c0_i32_0 = arith.constant 0 : i32
    return %arg0, %c0_i32 : i32, i32
  }
  func.func @transform_1(%arg0: i32) -> (i32, i32) {
    %c0_i32 = arith.constant 0 : i32
    %c0_i32_0 = arith.constant 0 : i32
    %c0_i32_1 = arith.constant 0 : i32
    return %c0_i32, %c0_i32_0 : i32, i32
  }
  func.func @transform_2(%arg0: i32) -> (i32, i32) {
    %c0_i32 = arith.constant 0 : i32
    %c0_i32_0 = arith.constant 0 : i32
    %c0_i32_1 = arith.constant 0 : i32
    return %c0_i32, %c0_i32_0 : i32, i32
  }
  func.func @transform_3(%arg0: i32) -> (i32, i32) {
    %c0_i32 = arith.constant 0 : i32
    %c0_i32_0 = arith.constant 0 : i32
    %c0_i32_1 = arith.constant 0 : i32
    return %c0_i32, %c0_i32_0 : i32, i32
  }
  func.func @transform_4(%arg0: i32) -> (i32, i32) {
    %c0_i32 = arith.constant 0 : i32
    %c0_i32_0 = arith.constant 0 : i32
    return %arg0, %c0_i32 : i32, i32
  }
}

</mosaic_0001>

<bundles_post_ra>
// kernel: conv2x_forward.2
= control target key start
LH: loop header
LB: loop body
LE: loop exit
PB: predicated region body
PF: predicated region fallthrough
CT: control target
= control target key end

     0   :  { %vm548_vm0 = vcmask 523264   ;;  %s1693_s1 = inlined_call_operand.vmem [shape: bf16[576,128], index: 1, kind: input, shape index: {}]   ;;  %s1694_s0 = inlined_call_operand.vmem [shape: bf16[128,576], index: 0, kind: input, shape index: {}]   ;;  %s1695_s2 = inlined_call_operand.vmem [shape: bf16[128,128], index: 2, kind: output, shape index: {}]  }
   0x1   :  { %v1299_v0 = vld [vmem:[%s1693_s1 + $0x40] sm:$0xff]   ;;  %v1303_v4 = vld [vmem:[%s1693_s1 + $0x48] sm:$0xff]   ;;  %v1307_v8 = vld [vmem:[%s1693_s1 + $0x50] sm:$0xff]  }
   0x2   :  { %v1300_v1 = vld [vmem:[%s1693_s1 + $0xc0] sm:$0xff]   ;;  %1127 = vmatprep.subr.bf16.mxu0 %v1299_v0  ;;  %v1304_v5 = vld [vmem:[%s1693_s1 + $0xc8] sm:$0xff]   ;;  %v1308_v9 = vld [vmem:[%s1693_s1 + $0xd0] sm:$0xff]  }
   0x3   :  { %v1301_v2 = vld [vmem:[%s1693_s1] sm:$0xff]   ;;  %1191 = vmatprep.subr.bf16.mxu1 %v1300_v1  ;;  %v1305_v6 = vld [vmem:[%s1693_s1 + $0x8] sm:$0xff]   ;;  %v1309_v10 = vld [vmem:[%s1693_s1 + $0x10] sm:$0xff]  }
   0x4   :  { %v1302_v3 = vld [vmem:[%s1693_s1 + $0x80] sm:$0xff]   ;;  %1128 = vmatpush3.bf16.msra.mxu0 %v1301_v2  ;;  %v1306_v7 = vld [vmem:[%s1693_s1 + $0x88] sm:$0xff]   ;;  %v1310_v11 = vld [vmem:[%s1693_s1 + $0x90] sm:$0xff]  }
   0x5   :  { %1192 = vmatpush3.bf16.msra.mxu1 %v1302_v3  ;;  %1129 = vmatprep.subr.bf16.mxu0 %v1303_v4  ;;  %v1311_v12 = vld [vmem:[%s1693_s1 + $0x58] sm:$0xff]   ;;  %v1315_v16 = vld [vmem:[%s1693_s1 + $0x60] sm:$0xff]   ;;  %v1319_v20 = vld [vmem:[%s1693_s1 + $0x68] sm:$0xff]  }
   0x6   :  { %1193 = vmatprep.subr.bf16.mxu1 %v1304_v5  ;;  %v1312_v13 = vld [vmem:[%s1693_s1 + $0xd8] sm:$0xff]   ;;  %v1316_v17 = vld [vmem:[%s1693_s1 + $0xe0] sm:$0xff]   ;;  %v1320_v21 = vld [vmem:[%s1693_s1 + $0xe8] sm:$0xff]  }
   0x7   :  { %v1313_v14 = vld [vmem:[%s1693_s1 + $0x18] sm:$0xff]   ;;  %v1317_v18 = vld [vmem:[%s1693_s1 + $0x20] sm:$0xff]   ;;  %v1321_v22 = vld [vmem:[%s1693_s1 + $0x28] sm:$0xff]  }
   0x8   :  { %1130 = vmatpush3.bf16.msra.mxu0 %v1305_v6  ;;  %v1314_v15 = vld [vmem:[%s1693_s1 + $0x98] sm:$0xff]   ;;  %v1318_v19 = vld [vmem:[%s1693_s1 + $0xa0] sm:$0xff]   ;;  %v1322_v23 = vld [vmem:[%s1693_s1 + $0xa8] sm:$0xff]  }
   0x9   :  { %1194 = vmatpush3.bf16.msra.mxu1 %v1306_v7  ;;  %1131 = vmatprep.subr.bf16.mxu0 %v1307_v8  ;;  %v1323_v24 = vld [vmem:[%s1693_s1 + $0x70] sm:$0xff]   ;;  %v1327_v28 = vld [vmem:[%s1693_s1 + $0x78] sm:$0xff]   ;;  %v1336_v35 = vld [vmem:[%s1694_s0 + $0xc] ss:$20 sps:$4 sm:$0xff]  }
   0xa   :  { %1195 = vmatprep.subr.bf16.mxu1 %v1308_v9  ;;  %v1324_v25 = vld [vmem:[%s1693_s1 + $0xf0] sm:$0xff]   ;;  %v1328_v29 = vld [vmem:[%s1693_s1 + $0xf8] sm:$0xff]   ;;  %v1337_v36 = vld [vmem:[%s1693_s1 + $0x100] sm:$0xff]   ;;  %702 = vmatprep.mubr.bf16.mxu1 %v1336_v35 }
   0xb   :  { %v1325_v26 = vld [vmem:[%s1693_s1 + $0x30] sm:$0xff]   ;;  %v1329_v30 = vld [vmem:[%s1693_s1 + $0x38] sm:$0xff]   ;;  %v1338_v37 = vld [vmem:[%s1694_s0 + $0x2c] ss:$20 sps:$4 sm:$0xff]  }
   0xc   :  { %1132 = vmatpush3.bf16.msra.mxu0 %v1309_v10  ;;  %v1326_v27 = vld [vmem:[%s1693_s1 + $0xb0] sm:$0xff]   ;;  %v1330_v31 = vld [vmem:[%s1693_s1 + $0xb8] sm:$0xff]   ;;  %v1350_v42 = vld [vmem:[%s1693_s1 + $0x108] sm:$0xff]  }
   0xd   :  { %1196 = vmatpush3.bf16.msra.mxu1 %v1310_v11  ;;  %1133 = vmatprep.subr.bf16.mxu0 %v1311_v12  ;;  %v1331_v32 = vld [vmem:[%s1694_s0] ss:$20 sps:$4 sm:$0xff]   ;;  %v1333_v33 = vld [vmem:[%s1694_s0 + $0x4] ss:$20 sps:$4 sm:$0xff]   ;;  %v1334_v34 = vld [vmem:[%s1694_s0 + $0x8] ss:$20 sps:$4 sm:$0xff]  }
   0xe   :  { %1197 = vmatprep.subr.bf16.mxu1 %v1312_v13  ;;  %605 = vmatprep.mubr.bf16.mxu0 %v1333_v33  ;;  %v1340_v38 = vld [vmem:[%s1694_s0 + $0x34] ss:$20 sps:$4 sm:$0xff]   ;;  %v1343_v40 = vld [vmem:[%s1694_s0 + $0x30] ss:$20 sps:$4 sm:$0xff]   ;;  %v1349_v45 = vld [vmem:[%s1694_s0 + $0x58] ss:$20 sps:$4 sm:$0xff]  }
   0xf   :  { %v1342_v39 = vld [vmem:[%s1694_s0 + $0x28] ss:$20 sps:$4 sm:$0xff]   ;;  %v1348_v44 = vld [vmem:[%s1694_s0 + $0x50] ss:$20 sps:$4 sm:$0xff]   ;;  %v1355_v50 = vld [vmem:[%s1694_s0 + $0x78] ss:$20 sps:$4 sm:$0xff]  }
  0x10   :  { %1134 = vmatpush3.bf16.msra.mxu0 %v1313_v14  ;;  %v1344_v41 = vld [vmem:[%s1694_s0 + $0x54] ss:$20 sps:$4 sm:$0xff]   ;;  %v1346_v43 = vld [vmem:[%s1694_s0 + $0x5c] ss:$20 sps:$4 sm:$0xff]   ;;  %v1353_v48 = vld [vmem:[%s1694_s0 + $0x84] ss:$20 sps:$4 sm:$0xff]  }
  0x11   :  { %1198 = vmatpush3.bf16.msra.mxu1 %v1314_v15  ;;  %1135 = vmatprep.subr.bf16.mxu0 %v1315_v16  ;;  %v1363_v46 = vld [vmem:[%s1693_s1 + $0x110] sm:$0xff]   ;;  %v1376_v49 = vld [vmem:[%s1693_s1 + $0x118] sm:$0xff]   ;;  %v1359_v53 = vld [vmem:[%s1694_s0 + $0xac] ss:$20 sps:$4 sm:$0xff]  }
  0x12   :  { %1199 = vmatprep.subr.bf16.mxu1 %v1316_v17  ;;  %v1351_v47 = vld [vmem:[%s1694_s0 + $0x7c] ss:$20 sps:$4 sm:$0xff]   ;;  %v1356_v51 = vld [vmem:[%s1694_s0 + $0x80] ss:$20 sps:$4 sm:$0xff]   ;;  %v1357_v52 = vld [vmem:[%s1694_s0 + $0xa4] ss:$20 sps:$4 sm:$0xff]  }
  0x13   :  { %v1361_v54 = vld [vmem:[%s1694_s0 + $0xa0] ss:$20 sps:$4 sm:$0xff]   ;;  %v1362_v55 = vld [vmem:[%s1694_s0 + $0xa8] ss:$20 sps:$4 sm:$0xff]   ;;  %v1369_v59 = vld [vmem:[%s1694_s0 + $0xd0] ss:$20 sps:$4 sm:$0xff]  }
  0x14   :  { %1136 = vmatpush3.bf16.msra.mxu0 %v1317_v18  ;;  %v1364_v56 = vld [vmem:[%s1694_s0 + $0xcc] ss:$20 sps:$4 sm:$0xff]   ;;  %v1366_v57 = vld [vmem:[%s1694_s0 + $0xd4] ss:$20 sps:$4 sm:$0xff]   ;;  %v1372_v61 = vld [vmem:[%s1694_s0 + $0xfc] ss:$20 sps:$4 sm:$0xff]  }
  0x15   :  { %1200 = vmatpush3.bf16.msra.mxu1 %v1318_v19  ;;  %1137 = vmatprep.subr.bf16.mxu0 %v1319_v20  ;;  %v1368_v58 = vld [vmem:[%s1694_s0 + $0xc8] ss:$20 sps:$4 sm:$0xff]   ;;  %v1374_v62 = vld [vmem:[%s1694_s0 + $0xf0] ss:$20 sps:$4 sm:$0xff]   ;;  %v1375_v63 = vld [vmem:[%s1694_s0 + $0xf8] ss:$20 sps:$4 sm:$0xff]  }
  0x16   :  { %1201 = vmatprep.subr.bf16.mxu1 %v1320_v21  ;;  %v1370_v60 = vld [vmem:[%s1694_s0 + $0xf4] ss:$20 sps:$4 sm:$0xff]   ;;  %v1377_v0 = vld [vmem:[%s1694_s0 + $0x11c] ss:$20 sps:$4 sm:$0xff]   ;;  %v1379_v1 = vld [vmem:[%s1694_s0 + $0x124] ss:$20 sps:$4 sm:$0xff]  }
  0x17   :  { %v1381_v2 = vld [vmem:[%s1694_s0 + $0x118] ss:$20 sps:$4 sm:$0xff]   ;;  %v1382_v3 = vld [vmem:[%s1694_s0 + $0x120] ss:$20 sps:$4 sm:$0xff]   ;;  %v1383_v4 = vld [vmem:[%s1694_s0 + $0x10] ss:$20 sps:$4 sm:$0xff]  }
  0x18   :  { %1138 = vmatpush3.bf16.msra.mxu0 %v1321_v22  ;;  %v1384_v5 = vld [vmem:[%s1694_s0 + $0xb0] ss:$20 sps:$4 sm:$0xff]   ;;  %v1385_v6 = vld [vmem:[%s1694_s0 + $0x38] ss:$20 sps:$4 sm:$0xff]   ;;  %v1387_v8 = vld [vmem:[%s1694_s0 + $0x60] ss:$20 sps:$4 sm:$0xff]  }
  0x19   :  { %1202 = vmatpush3.bf16.msra.mxu1 %v1322_v23  ;;  %1139 = vmatprep.subr.bf16.mxu0 %v1323_v24  ;;  %v1386_v7 = vld [vmem:[%s1694_s0 + $0xd8] ss:$20 sps:$4 sm:$0xff]   ;;  %v1388_v9 = vld [vmem:[%s1694_s0 + $0x100] ss:$20 sps:$4 sm:$0xff]   ;;  %v1389_v10 = vld [vmem:[%s1694_s0 + $0x88] ss:$20 sps:$4 sm:$0xff]  }
  0x1a   :  { %1203 = vmatprep.subr.bf16.mxu1 %v1324_v25  ;;  %v1390_v11 = vld [vmem:[%s1694_s0 + $0x128] ss:$20 sps:$4 sm:$0xff]  }
  0x1c   :  { %1140 = vmatpush3.bf16.msra.mxu0 %v1325_v26 }
  0x1d   :  { %1204 = vmatpush3.bf16.msra.mxu1 %v1326_v27  ;;  %1141 = vmatprep.subr.bf16.mxu0 %v1327_v28 }
  0x1e   :  { %1205 = vmatprep.subr.bf16.mxu1 %v1328_v29 }
  0x20   :  { %1142 = vmatpush3.bf16.msra.mxu0 %v1329_v30 }
  0x21   :  { %1206 = vmatpush3.bf16.msra.mxu1 %v1330_v31  ;;  %1267 = vmatprep.subr.bf16.mxu0 %v1337_v36 }
  0x22   :  { %1291 = vmatprep.subr.bf16.mxu1 %v1337_v36 }
  0x23   :  { %606 = vmatmul.mubr.bf16.vlgmr.msra.gmra.mrb[0].mxu0 %v1331_v32 }
  0x24   :  { %703 = vmatmul.mubr.bf16.vlgmr.msra.gmra.mrb[0].mxu1 %v1334_v34  ;;  %1268 = vmatpush3.bf16.msra.mxu0 %v1337_v36 }
  0x25   :  { %1295 = vmatpush3.bf16.msra.mxu1 %v1337_v36  ;;  %613 = vmatprep.mubr.bf16.mxu0 %v1338_v37 }
  0x26   :  { %710 = vmatprep.mubr.bf16.mxu1 %v1340_v38  ;;  %1269 = vmatprep.subr.bf16.mxu0 %v1350_v42 }
  0x27   :  { %1292 = vmatprep.subr.bf16.mxu1 %v1350_v42 }
  0x28   :  { %1270 = vmatpush3.bf16.msra.mxu0 %v1350_v42 }
  0x29   :  { %1296 = vmatpush3.bf16.msra.mxu1 %v1350_v42  ;;  %1271 = vmatprep.subr.bf16.mxu0 %v1363_v46 }
  0x2a   :  { %1293 = vmatprep.subr.bf16.mxu1 %v1363_v46 }
  0x2b   :  { %614 = vmatmul.mubr.bf16.gmra.mrb[4].mxu0 %v1342_v39 }
  0x2c   :  { %711 = vmatmul.mubr.bf16.gmra.mrb[4].mxu1 %v1343_v40  ;;  %621 = vmatprep.mubr.bf16.mxu0 %v1344_v41 }
  0x2d   :  { %718 = vmatprep.mubr.bf16.mxu1 %v1346_v43  ;;  %1272 = vmatpush3.bf16.msra.mxu0 %v1363_v46 }
  0x2e   :  { %1297 = vmatpush3.bf16.msra.mxu1 %v1363_v46  ;;  %1273 = vmatprep.subr.bf16.mxu0 %v1376_v49 }
  0x2f   :  { %1294 = vmatprep.subr.bf16.mxu1 %v1376_v49 }
  0x31   :  { %1274 = vmatpush3.bf16.msra.mxu0 %v1376_v49 }
  0x32   :  { %1298 = vmatpush3.bf16.msra.mxu1 %v1376_v49 }
  0x33   :  { %622 = vmatmul.mubr.bf16.gmra.mrb[8].mxu0 %v1348_v44 }
  0x34   :  { %719 = vmatmul.mubr.bf16.gmra.mrb[8].mxu1 %v1349_v45  ;;  %629 = vmatprep.mubr.bf16.mxu0 %v1351_v47 }
  0x35   :  { %726 = vmatprep.mubr.bf16.mxu1 %v1353_v48 }
  0x3b   :  { %630 = vmatmul.mubr.bf16.gmra.mrb[12].mxu0 %v1355_v50 }
  0x3c   :  { %727 = vmatmul.mubr.bf16.gmra.mrb[12].mxu1 %v1356_v51  ;;  %637 = vmatprep.mubr.bf16.mxu0 %v1357_v52 }
  0x3d   :  { %734 = vmatprep.mubr.bf16.mxu1 %v1359_v53 }
  0x43   :  { %638 = vmatmul.mubr.bf16.gmra.mrb[16].mxu0 %v1361_v54 }
  0x44   :  { %735 = vmatmul.mubr.bf16.gmra.mrb[16].mxu1 %v1362_v55  ;;  %645 = vmatprep.mubr.bf16.mxu0 %v1364_v56 }
  0x45   :  { %742 = vmatprep.mubr.bf16.mxu1 %v1366_v57 }
  0x4b   :  { %646 = vmatmul.mubr.bf16.gmra.mrb[20].mxu0 %v1368_v58 }
  0x4c   :  { %743 = vmatmul.mubr.bf16.gmra.mrb[20].mxu1 %v1369_v59  ;;  %653 = vmatprep.mubr.bf16.mxu0 %v1370_v60 }
  0x4d   :  { %750 = vmatprep.mubr.bf16.mxu1 %v1372_v61 }
  0x53   :  { %654 = vmatmul.mubr.bf16.gmra.mrb[24].mxu0 %v1374_v62 }
  0x54   :  { %751 = vmatmul.mubr.bf16.gmra.mrb[24].mxu1 %v1375_v63  ;;  %661 = vmatprep.mubr.bf16.mxu0 %v1377_v0 }
  0x55   :  { %758 = vmatprep.mubr.bf16.mxu1 %v1379_v1 }
  0x5b   :  { %662 = vmatmul.mubr.bf16.gmra.mrb[28].mxu0 %v1381_v2 }
  0x5c   :  { %759 = vmatmul.mubr.bf16.gmra.mrb[28].mxu1 %v1382_v3  ;;  %1275 = vmatprep.mubr.msk.bf16.mxu0 %vm548_vm0, %v1383_v4 }
  0x5d   :  { %1283 = vmatprep.mubr.msk.bf16.mxu1 %vm548_vm0, %v1384_v5 }
  0x63   :  { %1276 = vmatmul.mubr.msk.bf16.vlgmr.msra.gmra.mrb[32].mxu0 %vm548_vm0, %v1385_v6 }
  0x64   :  { %1284 = vmatmul.mubr.msk.bf16.vlgmr.msra.gmra.mrb[32].mxu1 %vm548_vm0, %v1386_v7  ;;  %1279 = vmatprep.mubr.msk.bf16.mxu0 %vm548_vm0, %v1387_v8 }
  0x65   :  { %1287 = vmatprep.mubr.msk.bf16.mxu1 %vm548_vm0, %v1388_v9 }
  0x6b   :  { %1280 = vmatmul.mubr.msk.bf16.gmra.mrb[36].mxu0 %vm548_vm0, %v1389_v10 }
  0x6c   :  { %1288 = vmatmul.mubr.msk.bf16.gmra.mrb[36].mxu1 %vm548_vm0, %v1390_v11 }
  0xf6   :  { %v1143_v12 = vpop.f32.mrb[0].mxu0 }
  0xf7   :  { %v1207_v13 = vpop.f32.mrb[0].mxu1  ;;  %v1144_v14 = vpop.f32.mrb[1].mxu0 }
  0xf8   :  { %v1145_v15 = vadd.f32 %v1144_v14, %v1143_v12  ;;  %v1208_v16 = vpop.f32.mrb[1].mxu1  ;;  %v1146_v17 = vpop.f32.mrb[2].mxu0 }
  0xf9   :  { %v1209_v18 = vadd.f32 %v1208_v16, %v1207_v13  ;;  %v1210_v19 = vpop.f32.mrb[2].mxu1  ;;  %v1147_v20 = vpop.f32.mrb[3].mxu0 }
  0xfa   :  { %v1148_v21 = vadd.f32 %v1147_v20, %v1146_v17  ;;  %v1211_v22 = vpop.f32.mrb[3].mxu1 }
  0xfb   :  { %v1212_v23 = vadd.f32 %v1211_v22, %v1210_v19  ;;  %v1642_v24 = vadd.f32 %v1209_v18, %v1145_v15 }
  0xfd   :  { %v1644_v25 = vadd.f32 %v1212_v23, %v1148_v21 }
  0xfe   :  { %v1149_v26 = vpop.f32.mrb[4].mxu0 }
  0xff   :  { %v1213_v27 = vpop.f32.mrb[4].mxu1  ;;  %v1150_v28 = vpop.f32.mrb[5].mxu0 }
 0x100   :  { %v1151_v29 = vadd.f32 %v1150_v28, %v1149_v26  ;;  %v1214_v30 = vpop.f32.mrb[5].mxu1  ;;  %v1152_v31 = vpop.f32.mrb[6].mxu0 }
 0x101   :  { %v1215_v32 = vadd.f32 %v1214_v30, %v1213_v27  ;;  %v1216_v33 = vpop.f32.mrb[6].mxu1  ;;  %v1153_v34 = vpop.f32.mrb[7].mxu0 }
 0x102   :  { %v1154_v35 = vadd.f32 %v1153_v34, %v1152_v31  ;;  %v1217_v36 = vpop.f32.mrb[7].mxu1 }
 0x103   :  { %v1218_v37 = vadd.f32 %v1217_v36, %v1216_v33  ;;  %v1646_v38 = vadd.f32 %v1215_v32, %v1151_v29 }
 0x105   :  { %v1648_v39 = vadd.f32 %v1218_v37, %v1154_v35 }
 0x106   :  { %v1155_v40 = vpop.f32.mrb[8].mxu0 }
 0x107   :  { %v1219_v41 = vpop.f32.mrb[8].mxu1  ;;  %v1156_v42 = vpop.f32.mrb[9].mxu0 }
 0x108   :  { %v1157_v43 = vadd.f32 %v1156_v42, %v1155_v40  ;;  %v1220_v44 = vpop.f32.mrb[9].mxu1  ;;  %v1158_v45 = vpop.f32.mrb[10].mxu0 }
 0x109   :  { %v1221_v46 = vadd.f32 %v1220_v44, %v1219_v41  ;;  %v1222_v47 = vpop.f32.mrb[10].mxu1  ;;  %v1159_v48 = vpop.f32.mrb[11].mxu0 }
 0x10a   :  { %v1160_v49 = vadd.f32 %v1159_v48, %v1158_v45  ;;  %v1223_v50 = vpop.f32.mrb[11].mxu1 }
 0x10b   :  { %v1224_v51 = vadd.f32 %v1223_v50, %v1222_v47  ;;  %v1650_v52 = vadd.f32 %v1221_v46, %v1157_v43 }
 0x10d   :  { %v1652_v53 = vadd.f32 %v1224_v51, %v1160_v49 }
 0x10e   :  { %v1161_v54 = vpop.f32.mrb[12].mxu0 }
 0x10f   :  { %v1225_v55 = vpop.f32.mrb[12].mxu1  ;;  %v1162_v56 = vpop.f32.mrb[13].mxu0 }
 0x110   :  { %v1163_v57 = vadd.f32 %v1162_v56, %v1161_v54  ;;  %v1226_v58 = vpop.f32.mrb[13].mxu1  ;;  %v1164_v59 = vpop.f32.mrb[14].mxu0 }
 0x111   :  { %v1227_v60 = vadd.f32 %v1226_v58, %v1225_v55  ;;  %v1228_v61 = vpop.f32.mrb[14].mxu1  ;;  %v1165_v62 = vpop.f32.mrb[15].mxu0 }
 0x112   :  { %v1166_v63 = vadd.f32 %v1165_v62, %v1164_v59  ;;  %v1229_v0 = vpop.f32.mrb[15].mxu1 }
 0x113   :  { %v1230_v1 = vadd.f32 %v1229_v0, %v1228_v61  ;;  %v1654_v2 = vadd.f32 %v1227_v60, %v1163_v57 }
 0x115   :  { %v1656_v3 = vadd.f32 %v1230_v1, %v1166_v63 }
 0x116   :  { %v1167_v4 = vpop.f32.mrb[16].mxu0 }
 0x117   :  { %v1231_v5 = vpop.f32.mrb[16].mxu1  ;;  %v1168_v6 = vpop.f32.mrb[17].mxu0 }
 0x118   :  { %v1169_v7 = vadd.f32 %v1168_v6, %v1167_v4  ;;  %v1232_v8 = vpop.f32.mrb[17].mxu1  ;;  %v1170_v9 = vpop.f32.mrb[18].mxu0 }
 0x119   :  { %v1233_v10 = vadd.f32 %v1232_v8, %v1231_v5  ;;  %v1234_v11 = vpop.f32.mrb[18].mxu1  ;;  %v1171_v12 = vpop.f32.mrb[19].mxu0 }
 0x11a   :  { %v1172_v13 = vadd.f32 %v1171_v12, %v1170_v9  ;;  %v1235_v14 = vpop.f32.mrb[19].mxu1 }
 0x11b   :  { %v1236_v15 = vadd.f32 %v1235_v14, %v1234_v11  ;;  %v737_v16 = vadd.f32 %v1233_v10, %v1169_v7 }
 0x11d   :  { %v740_v17 = vadd.f32 %v1236_v15, %v1172_v13 }
 0x11e   :  { %v1173_v18 = vpop.f32.mrb[20].mxu0 }
 0x11f   :  { %v1237_v19 = vpop.f32.mrb[20].mxu1  ;;  %v1174_v20 = vpop.f32.mrb[21].mxu0 }
 0x120   :  { %v1175_v21 = vadd.f32 %v1174_v20, %v1173_v18  ;;  %v1238_v22 = vpop.f32.mrb[21].mxu1  ;;  %v1176_v23 = vpop.f32.mrb[22].mxu0 }
 0x121   :  { %v1239_v26 = vadd.f32 %v1238_v22, %v1237_v19  ;;  %v1240_v27 = vpop.f32.mrb[22].mxu1  ;;  %v1177_v28 = vpop.f32.mrb[23].mxu0 }
 0x122   :  { %v1178_v29 = vadd.f32 %v1177_v28, %v1176_v23  ;;  %v1241_v30 = vpop.f32.mrb[23].mxu1 }
 0x123   :  { %v1242_v31 = vadd.f32 %v1241_v30, %v1240_v27  ;;  %v745_v32 = vadd.f32 %v1239_v26, %v1175_v21 }
 0x125   :  { %v748_v33 = vadd.f32 %v1242_v31, %v1178_v29 }
 0x126   :  { %v1179_v34 = vpop.f32.mrb[24].mxu0 }
 0x127   :  { %v1243_v35 = vpop.f32.mrb[24].mxu1  ;;  %v1180_v36 = vpop.f32.mrb[25].mxu0 }
 0x128   :  { %v1181_v37 = vadd.f32 %v1180_v36, %v1179_v34  ;;  %v1244_v40 = vpop.f32.mrb[25].mxu1  ;;  %v1182_v41 = vpop.f32.mrb[26].mxu0 }
 0x129   :  { %v1245_v42 = vadd.f32 %v1244_v40, %v1243_v35  ;;  %v1246_v43 = vpop.f32.mrb[26].mxu1  ;;  %v1183_v44 = vpop.f32.mrb[27].mxu0 }
 0x12a   :  { %v1184_v45 = vadd.f32 %v1183_v44, %v1182_v41  ;;  %v1247_v46 = vpop.f32.mrb[27].mxu1 }
 0x12b   :  { %v1248_v47 = vadd.f32 %v1247_v46, %v1246_v43  ;;  %v753_v48 = vadd.f32 %v1245_v42, %v1181_v37 }
 0x12d   :  { %v1658_v49 = vadd.f32 %v1248_v47, %v1184_v45 }
 0x12e   :  { %v1185_v50 = vpop.f32.mrb[28].mxu0 }
 0x12f   :  { %v1249_v51 = vpop.f32.mrb[28].mxu1  ;;  %v1186_v54 = vpop.f32.mrb[29].mxu0 }
 0x130   :  { %v1187_v55 = vadd.f32 %v1186_v54, %v1185_v50  ;;  %v1250_v56 = vpop.f32.mrb[29].mxu1  ;;  %v1188_v57 = vpop.f32.mrb[30].mxu0 }
 0x131   :  { %v1251_v58 = vadd.f32 %v1250_v56, %v1249_v51  ;;  %v1252_v59 = vpop.f32.mrb[30].mxu1  ;;  %v1189_v60 = vpop.f32.mrb[31].mxu0 }
 0x132   :  { %v1190_v61 = vadd.f32 %v1189_v60, %v1188_v57  ;;  %v1253_v62 = vpop.f32.mrb[31].mxu1 }
 0x133   :  { %v1254_v63 = vadd.f32 %v1253_v62, %v1252_v59  ;;  %v761_v0 = vadd.f32 %v1251_v58, %v1187_v55 }
 0x135   :  { %v764_v1 = vadd.f32 %v1254_v63, %v1190_v61 }
 0x136   :  { %v1277_v4 = vpop.f32.mrb[32].mxu0 }
 0x137   :  { %v810_v5 = vadd.f32 %v1277_v4, %v1646_v38  ;;  %v1285_v6 = vpop.f32.mrb[32].mxu1  ;;  %v801_v7 = vpop.f32.mrb[33].mxu0 }
 0x138   :  { %v842_v8 = vadd.f32 %v1285_v6, %v745_v32  ;;  %v802_v9 = vadd.f32 %v801_v7, %v1642_v24  ;;  %v833_v10 = vpop.f32.mrb[33].mxu1  ;;  %v1278_v11 = vpop.f32.mrb[34].mxu0 }
 0x139   :  { %v834_v12 = vadd.f32 %v833_v10, %v737_v16  ;;  %v813_v13 = vadd.f32 %v1278_v11, %v1648_v39  ;;  %v1286_v14 = vpop.f32.mrb[34].mxu1  ;;  %v804_v15 = vpop.f32.mrb[35].mxu0  ;;  %v866_v21 = vmax.f32 %v810_v5, 0.0 }
 0x13a   :  { %v845_v18 = vadd.f32 %v1286_v14, %v748_v33  ;;  %v805_v19 = vadd.f32 %v804_v15, %v1644_v25  ;;  %v836_v20 = vpop.f32.mrb[35].mxu1  ;;  %v874_v38 = vmax.f32 %v842_v8, 0.0  ;;  %v864_v26 = vmax.f32 %v802_v9, 0.0 }
 0x13b   :  { %v867_v22 = vmax.f32 %v813_v13, 0.0  ;;  %v837_v23 = vadd.f32 %v836_v20, %v740_v17  ;;  %v872_v29 = vmax.f32 %v834_v12, 0.0 }
 0x13c   :  { %v875_v27 = vmax.f32 %v845_v18, 0.0  ;;  %v865_v28 = vmax.f32 %v805_v19, 0.0 }
 0x13d   :  { %v1088_v24 = vpack.c.bf16 %v867_v22, %v866_v21  ;;  %v873_v30 = vmax.f32 %v837_v23, 0.0 }
 0x13e   :  { %v1108_v31 = vpack.c.bf16 %v875_v27, %v874_v38  ;;  %v1083_v16 = vpack.c.bf16 %v865_v28, %v864_v26  ;;  %v1281_v32 = vpop.f32.mrb[36].mxu0 }
 0x13f   :  { %1120 = vst [vmem:[%s1695_s2 + $0x8] sm:$0xff] %v1088_v24   ;;  %v1103_v39 = vpack.c.bf16 %v873_v30, %v872_v29  ;;  %v826_v25 = vadd.f32 %v1281_v32, %v1654_v2  ;;  %v1289_v33 = vpop.f32.mrb[36].mxu1  ;;  %v817_v34 = vpop.f32.mrb[37].mxu0 }
 0x140   :  { %1124 = vst [vmem:[%s1695_s2 + $0x28] sm:$0xff] %v1108_v31   ;;  %1084 = vst [vmem:[%s1695_s2] sm:$0xff] %v1083_v16   ;;  %v858_v17 = vadd.f32 %v1289_v33, %v761_v0  ;;  %v818_v35 = vadd.f32 %v817_v34, %v1650_v52  ;;  %v849_v36 = vpop.f32.mrb[37].mxu1  ;;  %v1282_v37 = vpop.f32.mrb[38].mxu0 }
 0x141   :  { %1123 = vst [vmem:[%s1695_s2 + $0x20] sm:$0xff] %v1103_v39   ;;  %v850_v2 = vadd.f32 %v849_v36, %v753_v48  ;;  %v829_v40 = vadd.f32 %v1282_v37, %v1656_v3  ;;  %v1290_v41 = vpop.f32.mrb[38].mxu1  ;;  %v820_v42 = vpop.f32.mrb[39].mxu0  ;;  %v870_v46 = vmax.f32 %v826_v25, 0.0 }
 0x142   :  { %v861_v43 = vadd.f32 %v1290_v41, %v764_v1  ;;  %v821_v44 = vadd.f32 %v820_v42, %v1652_v53  ;;  %v852_v45 = vpop.f32.mrb[39].mxu1  ;;  %v878_v52 = vmax.f32 %v858_v17, 0.0  ;;  %v868_v51 = vmax.f32 %v818_v35, 0.0 }
 0x143   :  { %v871_v47 = vmax.f32 %v829_v40, 0.0  ;;  %v853_v50 = vadd.f32 %v852_v45, %v1658_v49  ;;  %v876_v56 = vmax.f32 %v850_v2, 0.0 }
 0x144   :  { %v879_v54 = vmax.f32 %v861_v43, 0.0  ;;  %v869_v55 = vmax.f32 %v821_v44, 0.0 }
 0x145   :  { %v1098_v57 = vpack.c.bf16 %v871_v47, %v870_v46  ;;  %v877_v58 = vmax.f32 %v853_v50, 0.0 }
 0x146   :  { %v1118_v48 = vpack.c.bf16 %v879_v54, %v878_v52  ;;  %v1093_v59 = vpack.c.bf16 %v869_v55, %v868_v51 }
 0x147   :  { %1122 = vst [vmem:[%s1695_s2 + $0x18] sm:$0xff] %v1098_v57   ;;  %v1113_v3 = vpack.c.bf16 %v877_v58, %v876_v56 }
 0x148   :  { %1126 = vst [vmem:[%s1695_s2 + $0x38] sm:$0xff] %v1118_v48   ;;  %1121 = vst [vmem:[%s1695_s2 + $0x10] sm:$0xff] %v1093_v59  }
 0x149   :  { %1125 = vst [vmem:[%s1695_s2 + $0x30] sm:$0xff] %v1113_v3  }

// kernel: conv2x_forward.3
= control target key start
LH: loop header
LB: loop body
LE: loop exit
PB: predicated region body
PF: predicated region fallthrough
CT: control target
= control target key end

     0   :  { %s5409_s0 = inlined_call_operand.vmem [shape: bf16[128,2304], index: 0, kind: input, shape index: {}]   ;;  %s5410_s1 = inlined_call_operand.vmem [shape: bf16[2304,128], index: 1, kind: input, shape index: {}]   ;;  %s5411_s2 = inlined_call_operand.vmem [shape: f32[1,128], index: 2, kind: input, shape index: {}]   ;;  %s5412_s3 = inlined_call_operand.vmem [shape: f32[1,128], index: 3, kind: input, shape index: {}]   ;;  %s5413_s4 = inlined_call_operand.hbm [shape: f32[128,128], index: 4, kind: output, shape index: {}]  }
   0x1   :  { %v3887_v0 = vld [vmem:[%s5410_s1 + $0x40] sm:$0xff]   ;;  %v3889_v2 = vld [vmem:[%s5410_s1 + $0x48] sm:$0xff]   ;;  %v3891_v4 = vld [vmem:[%s5410_s1 + $0x50] sm:$0xff]  }
   0x2   :  { %v3888_v1 = vld [vmem:[%s5410_s1] sm:$0xff]   ;;  %3292 = vmatprep.subr.bf16.mxu0 %v3887_v0  ;;  %3868 = vmatprep.subr.bf16.mxu1 %v3887_v0  ;;  %v3890_v3 = vld [vmem:[%s5410_s1 + $0x8] sm:$0xff]   ;;  %v3892_v5 = vld [vmem:[%s5410_s1 + $0x10] sm:$0xff]  }
   0x3   :  { %3293 = vmatpush3.bf16.msra.mxu0 %v3888_v1  ;;  %3876 = vmatpush3.bf16.msra.mxu1 %v3888_v1  ;;  %v3893_v6 = vld [vmem:[%s5410_s1 + $0x58] sm:$0xff]   ;;  %v3895_v8 = vld [vmem:[%s5410_s1 + $0x60] sm:$0xff]   ;;  %v3897_v10 = vld [vmem:[%s5410_s1 + $0x68] sm:$0xff]  }
   0x4   :  { %3294 = vmatprep.subr.bf16.mxu0 %v3889_v2  ;;  %3869 = vmatprep.subr.bf16.mxu1 %v3889_v2  ;;  %v3894_v7 = vld [vmem:[%s5410_s1 + $0x18] sm:$0xff]   ;;  %v3896_v9 = vld [vmem:[%s5410_s1 + $0x20] sm:$0xff]   ;;  %v3898_v13 = vld [vmem:[%s5410_s1 + $0x28] sm:$0xff]  }
   0x5   :  { %v3905_v11 = vld [vmem:[%s5409_s0 + $0x4] ss:$72 sps:$4 sm:$0xff]   ;;  %v3899_v14 = vld [vmem:[%s5410_s1 + $0x70] sm:$0xff]   ;;  %v3901_v16 = vld [vmem:[%s5410_s1 + $0x78] sm:$0xff]  }
   0x6   :  { %v3908_v12 = vld [vmem:[%s5409_s0 + $0x244] ss:$72 sps:$4 sm:$0xff]   ;;  %2067 = vmatprep.mubr.bf16.mxu0 %v3905_v11  ;;  %v3900_v15 = vld [vmem:[%s5410_s1 + $0x30] sm:$0xff]   ;;  %v3902_v17 = vld [vmem:[%s5410_s1 + $0x38] sm:$0xff]  }
   0x7   :  { %3295 = vmatpush3.bf16.msra.mxu0 %v3890_v3  ;;  %3877 = vmatpush3.bf16.msra.mxu1 %v3890_v3  ;;  %v3903_v18 = vld [vmem:[%s5409_s0] ss:$72 sps:$4 sm:$0xff]   ;;  %v3917_v26 = vld [vmem:[%s5409_s0 + $0x94] ss:$72 sps:$4 sm:$0xff]   ;;  %v3921_v31 = vld [vmem:[%s5409_s0 + $0x90] ss:$72 sps:$4 sm:$0xff]  }
   0x8   :  { %3296 = vmatprep.subr.bf16.mxu0 %v3891_v4  ;;  %3870 = vmatprep.subr.bf16.mxu1 %v3891_v4  ;;  %v3906_v19 = vld [vmem:[%s5409_s0 + $0x240] ss:$72 sps:$4 sm:$0xff]   ;;  %v3919_v28 = vld [vmem:[%s5409_s0 + $0x2d4] ss:$72 sps:$4 sm:$0xff]   ;;  %v3922_v33 = vld [vmem:[%s5409_s0 + $0x2d0] ss:$72 sps:$4 sm:$0xff]  }
   0x9   :  { %2099 = vmatprep.mubr.bf16.mxu1 %v3908_v12  ;;  %v3909_v20 = vld [vmem:[%s5410_s1 + $0xc0] sm:$0xff]   ;;  %v3913_v24 = vld [vmem:[%s5410_s1 + $0xc8] sm:$0xff]   ;;  %v3923_v30 = vld [vmem:[%s5410_s1 + $0xd0] sm:$0xff]  }
   0xa   :  { %v3910_v21 = vld [vmem:[%s5410_s1 + $0x140] sm:$0xff]   ;;  %v3914_v25 = vld [vmem:[%s5410_s1 + $0x148] sm:$0xff]   ;;  %v3924_v32 = vld [vmem:[%s5410_s1 + $0x150] sm:$0xff]  }
   0xb   :  { %3297 = vmatpush3.bf16.msra.mxu0 %v3892_v5  ;;  %3878 = vmatpush3.bf16.msra.mxu1 %v3892_v5  ;;  %v3911_v22 = vld [vmem:[%s5410_s1 + $0x80] sm:$0xff]   ;;  %v3915_v27 = vld [vmem:[%s5410_s1 + $0x88] sm:$0xff]   ;;  %v3925_v34 = vld [vmem:[%s5410_s1 + $0x90] sm:$0xff]  }
   0xc   :  { %3298 = vmatprep.subr.bf16.mxu0 %v3893_v6  ;;  %3871 = vmatprep.subr.bf16.mxu1 %v3893_v6  ;;  %v3912_v23 = vld [vmem:[%s5410_s1 + $0x100] sm:$0xff]   ;;  %v3916_v29 = vld [vmem:[%s5410_s1 + $0x108] sm:$0xff]   ;;  %v3926_v35 = vld [vmem:[%s5410_s1 + $0x110] sm:$0xff]  }
   0xd   :  { %v3927_v36 = vld [vmem:[%s5410_s1 + $0xd8] sm:$0xff]   ;;  %v3931_v38 = vld [vmem:[%s5409_s0 + $0x124] ss:$72 sps:$4 sm:$0xff]   ;;  %v3935_v43 = vld [vmem:[%s5409_s0 + $0x120] ss:$72 sps:$4 sm:$0xff]  }
   0xe   :  { %v3928_v37 = vld [vmem:[%s5410_s1 + $0x158] sm:$0xff]   ;;  %v3933_v40 = vld [vmem:[%s5409_s0 + $0x364] ss:$72 sps:$4 sm:$0xff]   ;;  %v3936_v44 = vld [vmem:[%s5409_s0 + $0x360] ss:$72 sps:$4 sm:$0xff]  }
   0xf   :  { %3299 = vmatpush3.bf16.msra.mxu0 %v3894_v7  ;;  %3879 = vmatpush3.bf16.msra.mxu1 %v3894_v7  ;;  %v3929_v39 = vld [vmem:[%s5410_s1 + $0x98] sm:$0xff]   ;;  %v3937_v42 = vld [vmem:[%s5410_s1 + $0xe0] sm:$0xff]   ;;  %v3941_v48 = vld [vmem:[%s5410_s1 + $0xe8] sm:$0xff]  }
  0x10   :  { %3300 = vmatprep.subr.bf16.mxu0 %v3895_v8  ;;  %3872 = vmatprep.subr.bf16.mxu1 %v3895_v8  ;;  %v3930_v41 = vld [vmem:[%s5410_s1 + $0x118] sm:$0xff]   ;;  %v3938_v45 = vld [vmem:[%s5410_s1 + $0x160] sm:$0xff]   ;;  %v3942_v49 = vld [vmem:[%s5410_s1 + $0x168] sm:$0xff]  }
  0x11   :  { %v3939_v46 = vld [vmem:[%s5410_s1 + $0xa0] sm:$0xff]   ;;  %v3945_v50 = vld [vmem:[%s5409_s0 + $0x1b4] ss:$72 sps:$4 sm:$0xff]   ;;  %v3943_v52 = vld [vmem:[%s5410_s1 + $0xa8] sm:$0xff]  }
  0x12   :  { %v3940_v47 = vld [vmem:[%s5410_s1 + $0x120] sm:$0xff]   ;;  %v3947_v51 = vld [vmem:[%s5409_s0 + $0x3f4] ss:$72 sps:$4 sm:$0xff]   ;;  %v3944_v53 = vld [vmem:[%s5410_s1 + $0x128] sm:$0xff]  }
  0x13   :  { %3301 = vmatpush3.bf16.msra.mxu0 %v3896_v9  ;;  %3880 = vmatpush3.bf16.msra.mxu1 %v3896_v9  ;;  %v3951_v54 = vld [vmem:[%s5410_s1 + $0xf0] sm:$0xff]   ;;  %v3955_v60 = vld [vmem:[%s5410_s1 + $0xf8] sm:$0xff]   ;;  %v3965_v4 = vld [vmem:[%s5410_s1 + $0x1c0] sm:$0xff]  }
  0x14   :  { %3302 = vmatprep.subr.bf16.mxu0 %v3897_v10  ;;  %3873 = vmatprep.subr.bf16.mxu1 %v3897_v10  ;;  %v3949_v55 = vld [vmem:[%s5409_s0 + $0x1b0] ss:$72 sps:$4 sm:$0xff]   ;;  %v3961_v0 = vld [vmem:[%s5409_s0 + $0xc] ss:$72 sps:$4 sm:$0xff]   ;;  %v3966_v5 = vld [vmem:[%s5410_s1 + $0x180] sm:$0xff]  }
  0x15   :  { %v3950_v56 = vld [vmem:[%s5409_s0 + $0x3f0] ss:$72 sps:$4 sm:$0xff]   ;;  %v3964_v3 = vld [vmem:[%s5409_s0 + $0x14] ss:$72 sps:$4 sm:$0xff]   ;;  %v3967_v6 = vld [vmem:[%s5410_s1 + $0x240] sm:$0xff]  }
  0x16   :  { %v3952_v57 = vld [vmem:[%s5410_s1 + $0x170] sm:$0xff]   ;;  %v3956_v61 = vld [vmem:[%s5410_s1 + $0x178] sm:$0xff]   ;;  %v3968_v7 = vld [vmem:[%s5410_s1 + $0x200] sm:$0xff]  }
  0x17   :  { %3303 = vmatpush3.bf16.msra.mxu0 %v3898_v13  ;;  %3881 = vmatpush3.bf16.msra.mxu1 %v3898_v13  ;;  %v3953_v58 = vld [vmem:[%s5410_s1 + $0xb0] sm:$0xff]   ;;  %v3957_v62 = vld [vmem:[%s5410_s1 + $0xb8] sm:$0xff]   ;;  %v3971_v9 = vld [vmem:[%s5409_s0 + $0xa4] ss:$72 sps:$4 sm:$0xff]  }
  0x18   :  { %3304 = vmatprep.subr.bf16.mxu0 %v3899_v14  ;;  %3874 = vmatprep.subr.bf16.mxu1 %v3899_v14  ;;  %v3954_v59 = vld [vmem:[%s5410_s1 + $0x130] sm:$0xff]   ;;  %v3958_v63 = vld [vmem:[%s5410_s1 + $0x138] sm:$0xff]   ;;  %v3974_v11 = vld [vmem:[%s5409_s0 + $0xa0] ss:$72 sps:$4 sm:$0xff]  }
  0x19   :  { %v3959_v1 = vld [vmem:[%s5409_s0 + $0x8] ss:$72 sps:$4 sm:$0xff]   ;;  %v3969_v8 = vld [vmem:[%s5409_s0 + $0x9c] ss:$72 sps:$4 sm:$0xff]   ;;  %v3973_v10 = vld [vmem:[%s5409_s0 + $0x98] ss:$72 sps:$4 sm:$0xff]  }
  0x1a   :  { %v3962_v2 = vld [vmem:[%s5409_s0 + $0x10] ss:$72 sps:$4 sm:$0xff]   ;;  %v3975_v12 = vld [vmem:[%s5410_s1 + $0x1c8] sm:$0xff]  }
  0x1b   :  { %3305 = vmatpush3.bf16.msra.mxu0 %v3900_v15  ;;  %3882 = vmatpush3.bf16.msra.mxu1 %v3900_v15  ;;  %v3976_v13 = vld [vmem:[%s5410_s1 + $0x188] sm:$0xff]  }
  0x1c   :  { %3306 = vmatprep.subr.bf16.mxu0 %v3901_v16  ;;  %3875 = vmatprep.subr.bf16.mxu1 %v3901_v16  ;;  %v3977_v14 = vld [vmem:[%s5410_s1 + $0x248] sm:$0xff]  }
  0x1d   :  { %v3978_v15 = vld [vmem:[%s5410_s1 + $0x208] sm:$0xff]  }
  0x1e   :  { %v3979_v16 = vld [vmem:[%s5409_s0 + $0x12c] ss:$72 sps:$4 sm:$0xff]  }
  0x1f   :  { %3307 = vmatpush3.bf16.msra.mxu0 %v3902_v17  ;;  %3883 = vmatpush3.bf16.msra.mxu1 %v3902_v17  ;;  %v3981_v17 = vld [vmem:[%s5409_s0 + $0x134] ss:$72 sps:$4 sm:$0xff]  }
  0x20   :  { %3356 = vmatprep.subr.bf16.mxu1 %v3909_v20  ;;  %3420 = vmatprep.subr.bf16.mxu0 %v3910_v21  ;;  %v3984_v20 = vld [vmem:[%s5409_s0 + $0x130] ss:$72 sps:$4 sm:$0xff]  }
  0x21   :  { %v3986_v21 = vld [vmem:[%s5410_s1 + $0x190] sm:$0xff]  }
  0x22   :  { %2068 = vmatmul.mubr.bf16.vlgmr.msra.gmra.mrb[0].mxu0 %v3903_v18  ;;  %2100 = vmatmul.mubr.bf16.vlgmr.msra.gmra.mrb[0].mxu1 %v3906_v19  ;;  %v3985_v18 = vld [vmem:[%s5410_s1 + $0x1d0] sm:$0xff]  }
  0x23   :  { %3357 = vmatpush3.bf16.msra.mxu1 %v3911_v22  ;;  %3421 = vmatpush3.bf16.msra.mxu0 %v3912_v23  ;;  %v3983_v19 = vld [vmem:[%s5409_s0 + $0x128] ss:$72 sps:$4 sm:$0xff]  }
  0x24   :  { %3358 = vmatprep.subr.bf16.mxu1 %v3913_v24  ;;  %3422 = vmatprep.subr.bf16.mxu0 %v3914_v25  ;;  %v3987_v22 = vld [vmem:[%s5410_s1 + $0x250] sm:$0xff]   ;;  %v3989_v24 = vld [vmem:[%s5409_s0 + $0x1bc] ss:$72 sps:$4 sm:$0xff]  }
  0x25   :  { %2075 = vmatprep.mubr.bf16.mxu0 %v3917_v26  ;;  %2107 = vmatprep.mubr.bf16.mxu1 %v3919_v28  ;;  %v3988_v23 = vld [vmem:[%s5410_s1 + $0x210] sm:$0xff]   ;;  %v3991_v25 = vld [vmem:[%s5409_s0 + $0x1c4] ss:$72 sps:$4 sm:$0xff]   ;;  %v3995_v26 = vld [vmem:[%s5410_s1 + $0x1d8] sm:$0xff]  }
  0x26   :  { %v3993_v28 = vld [vmem:[%s5409_s0 + $0x1b8] ss:$72 sps:$4 sm:$0xff]  }
  0x27   :  { %3359 = vmatpush3.bf16.msra.mxu1 %v3915_v27  ;;  %3423 = vmatpush3.bf16.msra.mxu0 %v3916_v29  ;;  %v3996_v27 = vld [vmem:[%s5410_s1 + $0x198] sm:$0xff]  }
  0x28   :  { %3360 = vmatprep.subr.bf16.mxu1 %v3923_v30  ;;  %3424 = vmatprep.subr.bf16.mxu0 %v3924_v32  ;;  %v3997_v29 = vld [vmem:[%s5410_s1 + $0x258] sm:$0xff]   ;;  %v3999_v32 = vld [vmem:[%s5409_s0 + $0x24c] ss:$72 sps:$4 sm:$0xff]  }
  0x29   :  { %v3998_v30 = vld [vmem:[%s5410_s1 + $0x218] sm:$0xff]  }
  0x2a   :  { %2076 = vmatmul.mubr.bf16.gmra.mrb[4].mxu0 %v3921_v31  ;;  %2108 = vmatmul.mubr.bf16.gmra.mrb[4].mxu1 %v3922_v33  ;;  %v3994_v31 = vld [vmem:[%s5409_s0 + $0x1c0] ss:$72 sps:$4 sm:$0xff]   ;;  %v4001_v33 = vld [vmem:[%s5409_s0 + $0x254] ss:$72 sps:$4 sm:$0xff]  }
  0x2b   :  { %3361 = vmatpush3.bf16.msra.mxu1 %v3925_v34  ;;  %3425 = vmatpush3.bf16.msra.mxu0 %v3926_v35  ;;  %v4005_v34 = vld [vmem:[%s5410_s1 + $0x1e0] sm:$0xff]  }
  0x2c   :  { %3362 = vmatprep.subr.bf16.mxu1 %v3927_v36  ;;  %3426 = vmatprep.subr.bf16.mxu0 %v3928_v37  ;;  %v4006_v35 = vld [vmem:[%s5410_s1 + $0x1a0] sm:$0xff]  }
  0x2d   :  { %2083 = vmatprep.mubr.bf16.mxu0 %v3931_v38  ;;  %2115 = vmatprep.mubr.bf16.mxu1 %v3933_v40  ;;  %v4007_v36 = vld [vmem:[%s5410_s1 + $0x260] sm:$0xff]   ;;  %v4003_v38 = vld [vmem:[%s5409_s0 + $0x248] ss:$72 sps:$4 sm:$0xff]  }
  0x2e   :  { %v4008_v37 = vld [vmem:[%s5410_s1 + $0x220] sm:$0xff]  }
  0x2f   :  { %3363 = vmatpush3.bf16.msra.mxu1 %v3929_v39  ;;  %3427 = vmatpush3.bf16.msra.mxu0 %v3930_v41  ;;  %v4004_v39 = vld [vmem:[%s5409_s0 + $0x250] ss:$72 sps:$4 sm:$0xff]   ;;  %v4009_v40 = vld [vmem:[%s5409_s0 + $0x2dc] ss:$72 sps:$4 sm:$0xff]  }
  0x30   :  { %3364 = vmatprep.subr.bf16.mxu1 %v3937_v42  ;;  %3428 = vmatprep.subr.bf16.mxu0 %v3938_v45  ;;  %v4011_v41 = vld [vmem:[%s5409_s0 + $0x2e4] ss:$72 sps:$4 sm:$0xff]  }
  0x31   :  { %v4015_v42 = vld [vmem:[%s5410_s1 + $0x1e8] sm:$0xff]  }
  0x32   :  { %2084 = vmatmul.mubr.bf16.gmra.mrb[8].mxu0 %v3935_v43  ;;  %2116 = vmatmul.mubr.bf16.gmra.mrb[8].mxu1 %v3936_v44  ;;  %v4016_v43 = vld [vmem:[%s5410_s1 + $0x1a8] sm:$0xff]  }
  0x33   :  { %3365 = vmatpush3.bf16.msra.mxu1 %v3939_v46  ;;  %3429 = vmatpush3.bf16.msra.mxu0 %v3940_v47  ;;  %v4017_v44 = vld [vmem:[%s5410_s1 + $0x268] sm:$0xff]   ;;  %v4013_v46 = vld [vmem:[%s5409_s0 + $0x2d8] ss:$72 sps:$4 sm:$0xff]  }
  0x34   :  { %3366 = vmatprep.subr.bf16.mxu1 %v3941_v48  ;;  %3430 = vmatprep.subr.bf16.mxu0 %v3942_v49  ;;  %v4018_v45 = vld [vmem:[%s5410_s1 + $0x228] sm:$0xff]   ;;  %v4021_v49 = vld [vmem:[%s5409_s0 + $0x374] ss:$72 sps:$4 sm:$0xff]  }
  0x35   :  { %2091 = vmatprep.mubr.bf16.mxu0 %v3945_v50  ;;  %2123 = vmatprep.mubr.bf16.mxu1 %v3947_v51  ;;  %v4014_v47 = vld [vmem:[%s5409_s0 + $0x2e0] ss:$72 sps:$4 sm:$0xff]   ;;  %v4019_v48 = vld [vmem:[%s5409_s0 + $0x36c] ss:$72 sps:$4 sm:$0xff]  }
  0x36   :  { %v4025_v50 = vld [vmem:[%s5410_s1 + $0x1f0] sm:$0xff]  }
  0x37   :  { %3367 = vmatpush3.bf16.msra.mxu1 %v3943_v52  ;;  %3431 = vmatpush3.bf16.msra.mxu0 %v3944_v53  ;;  %v4026_v51 = vld [vmem:[%s5410_s1 + $0x1b0] sm:$0xff]  }
  0x38   :  { %3368 = vmatprep.subr.bf16.mxu1 %v3951_v54  ;;  %3432 = vmatprep.subr.bf16.mxu0 %v3952_v57  ;;  %v4027_v52 = vld [vmem:[%s5410_s1 + $0x270] sm:$0xff]   ;;  %v4029_v57 = vld [vmem:[%s5409_s0 + $0x3fc] ss:$72 sps:$4 sm:$0xff]  }
  0x39   :  { %v4028_v53 = vld [vmem:[%s5410_s1 + $0x230] sm:$0xff]  }
  0x3a   :  { %2092 = vmatmul.mubr.bf16.gmra.mrb[12].mxu0 %v3949_v55  ;;  %2124 = vmatmul.mubr.bf16.gmra.mrb[12].mxu1 %v3950_v56  ;;  %v4023_v54 = vld [vmem:[%s5409_s0 + $0x368] ss:$72 sps:$4 sm:$0xff]   ;;  %v4035_v56 = vld [vmem:[%s5410_s1 + $0x1f8] sm:$0xff]  }
  0x3b   :  { %3369 = vmatpush3.bf16.msra.mxu1 %v3953_v58  ;;  %3433 = vmatpush3.bf16.msra.mxu0 %v3954_v59  ;;  %v4024_v55 = vld [vmem:[%s5409_s0 + $0x370] ss:$72 sps:$4 sm:$0xff]   ;;  %v4031_v58 = vld [vmem:[%s5409_s0 + $0x404] ss:$72 sps:$4 sm:$0xff]  }
  0x3c   :  { %3370 = vmatprep.subr.bf16.mxu1 %v3955_v60  ;;  %3434 = vmatprep.subr.bf16.mxu0 %v3956_v61  ;;  %v4036_v59 = vld [vmem:[%s5410_s1 + $0x1b8] sm:$0xff]  }
  0x3d   :  { %2164 = vmatprep.mubr.bf16.mxu1 %v3961_v0  ;;  %2261 = vmatprep.mubr.bf16.mxu0 %v3964_v3  ;;  %v4037_v60 = vld [vmem:[%s5410_s1 + $0x278] sm:$0xff]   ;;  %v4034_v0 = vld [vmem:[%s5409_s0 + $0x400] ss:$72 sps:$4 sm:$0xff]   ;;  %v4044_v3 = vld [vmem:[%s5409_s0 + $0x24] ss:$72 sps:$4 sm:$0xff]  }
  0x3e   :  { %v4038_v61 = vld [vmem:[%s5410_s1 + $0x238] sm:$0xff]  }
  0x3f   :  { %3371 = vmatpush3.bf16.msra.mxu1 %v3957_v62  ;;  %3435 = vmatpush3.bf16.msra.mxu0 %v3958_v63  ;;  %v4045_v62 = vld [vmem:[%s5410_s1 + $0x2c0] sm:$0xff]  }
  0x40   :  { %3484 = vmatprep.subr.bf16.mxu1 %v3965_v4  ;;  %3548 = vmatprep.subr.bf16.mxu0 %v3967_v6  ;;  %v4033_v63 = vld [vmem:[%s5409_s0 + $0x3f8] ss:$72 sps:$4 sm:$0xff]  }
  0x41   :  { %v4039_v4 = vld [vmem:[%s5409_s0 + $0x18] ss:$72 sps:$4 sm:$0xff]  }
  0x42   :  { %2165 = vmatmul.mubr.bf16.vlgmr.msra.gmra.mrb[16].mxu1 %v3959_v1  ;;  %2262 = vmatmul.mubr.bf16.vlgmr.msra.gmra.mrb[16].mxu0 %v3962_v2  ;;  %v4047_v1 = vld [vmem:[%s5410_s1 + $0x340] sm:$0xff]  }
  0x43   :  { %3485 = vmatpush3.bf16.msra.mxu1 %v3966_v5  ;;  %3549 = vmatpush3.bf16.msra.mxu0 %v3968_v7  ;;  %v4041_v2 = vld [vmem:[%s5409_s0 + $0x1c] ss:$72 sps:$4 sm:$0xff]   ;;  %v4042_v5 = vld [vmem:[%s5409_s0 + $0x20] ss:$72 sps:$4 sm:$0xff]  }
  0x44   :  { %2172 = vmatprep.mubr.bf16.mxu1 %v3969_v8  ;;  %2269 = vmatprep.mubr.bf16.mxu0 %v3971_v9  ;;  %v4046_v6 = vld [vmem:[%s5410_s1 + $0x280] sm:$0xff]   ;;  %v4049_v8 = vld [vmem:[%s5409_s0 + $0xac] ss:$72 sps:$4 sm:$0xff]  }
  0x45   :  { %3486 = vmatprep.subr.bf16.mxu1 %v3975_v12  ;;  %3550 = vmatprep.subr.bf16.mxu0 %v3977_v14  ;;  %v4048_v7 = vld [vmem:[%s5410_s1 + $0x300] sm:$0xff]   ;;  %v4051_v9 = vld [vmem:[%s5409_s0 + $0xb4] ss:$72 sps:$4 sm:$0xff]   ;;  %v4057_v12 = vld [vmem:[%s5410_s1 + $0x348] sm:$0xff]  }
  0x46   :  { %v4065_v14 = vld [vmem:[%s5410_s1 + $0x2d0] sm:$0xff]  }
  0x47   :  { %3487 = vmatpush3.bf16.msra.mxu1 %v3976_v13  ;;  %3551 = vmatpush3.bf16.msra.mxu0 %v3978_v15  ;;  %v4058_v13 = vld [vmem:[%s5410_s1 + $0x308] sm:$0xff]  }
  0x48   :  { %3488 = vmatprep.subr.bf16.mxu1 %v3985_v18  ;;  %3552 = vmatprep.subr.bf16.mxu0 %v3987_v22  ;;  %v4053_v15 = vld [vmem:[%s5409_s0 + $0xa8] ss:$72 sps:$4 sm:$0xff]   ;;  %v4059_v18 = vld [vmem:[%s5409_s0 + $0x13c] ss:$72 sps:$4 sm:$0xff]  }
  0x49   :  { %v4075_v22 = vld [vmem:[%s5410_s1 + $0x2d8] sm:$0xff]  }
  0x4a   :  { %2173 = vmatmul.mubr.bf16.gmra.mrb[20].mxu1 %v3973_v10  ;;  %2270 = vmatmul.mubr.bf16.gmra.mrb[20].mxu0 %v3974_v11  ;;  %v4055_v10 = vld [vmem:[%s5410_s1 + $0x2c8] sm:$0xff]  }
  0x4b   :  { %2180 = vmatprep.mubr.bf16.mxu1 %v3979_v16  ;;  %2277 = vmatprep.mubr.bf16.mxu0 %v3981_v17  ;;  %v4056_v11 = vld [vmem:[%s5410_s1 + $0x288] sm:$0xff]   ;;  %v4054_v16 = vld [vmem:[%s5409_s0 + $0xb0] ss:$72 sps:$4 sm:$0xff]  }
  0x4c   :  { %3489 = vmatpush3.bf16.msra.mxu1 %v3986_v21  ;;  %3553 = vmatpush3.bf16.msra.mxu0 %v3988_v23  ;;  %v4067_v17 = vld [vmem:[%s5410_s1 + $0x350] sm:$0xff]   ;;  %v4077_v23 = vld [vmem:[%s5410_s1 + $0x358] sm:$0xff]  }
  0x4d   :  { %3490 = vmatprep.subr.bf16.mxu1 %v3995_v26  ;;  %3554 = vmatprep.subr.bf16.mxu0 %v3997_v29  ;;  %v4068_v21 = vld [vmem:[%s5410_s1 + $0x310] sm:$0xff]   ;;  %v4076_v26 = vld [vmem:[%s5410_s1 + $0x298] sm:$0xff]  }
  0x4e   :  { %v4071_v29 = vld [vmem:[%s5409_s0 + $0x1d4] ss:$72 sps:$4 sm:$0xff]  }
  0x50   :  { %3491 = vmatpush3.bf16.msra.mxu1 %v3996_v27  ;;  %3555 = vmatpush3.bf16.msra.mxu0 %v3998_v30  ;;  %v4078_v27 = vld [vmem:[%s5410_s1 + $0x318] sm:$0xff]   ;;  %v4085_v30 = vld [vmem:[%s5410_s1 + $0x2e0] sm:$0xff]  }
  0x51   :  { %3492 = vmatprep.subr.bf16.mxu1 %v4005_v34  ;;  %3556 = vmatprep.subr.bf16.mxu0 %v4007_v36  ;;  %v4073_v34 = vld [vmem:[%s5409_s0 + $0x1c8] ss:$72 sps:$4 sm:$0xff]  }
  0x52   :  { %2181 = vmatmul.mubr.bf16.gmra.mrb[24].mxu1 %v3983_v19  ;;  %2278 = vmatmul.mubr.bf16.gmra.mrb[24].mxu0 %v3984_v20  ;;  %v4061_v19 = vld [vmem:[%s5409_s0 + $0x144] ss:$72 sps:$4 sm:$0xff]   ;;  %v4066_v20 = vld [vmem:[%s5410_s1 + $0x290] sm:$0xff]  }
  0x53   :  { %2188 = vmatprep.mubr.bf16.mxu1 %v3989_v24  ;;  %2285 = vmatprep.mubr.bf16.mxu0 %v3991_v25  ;;  %v4063_v24 = vld [vmem:[%s5409_s0 + $0x138] ss:$72 sps:$4 sm:$0xff]   ;;  %v4095_v36 = vld [vmem:[%s5410_s1 + $0x2e8] sm:$0xff]  }
  0x54   :  { %3493 = vmatpush3.bf16.msra.mxu1 %v4006_v35  ;;  %3557 = vmatpush3.bf16.msra.mxu0 %v4008_v37  ;;  %v4064_v25 = vld [vmem:[%s5409_s0 + $0x140] ss:$72 sps:$4 sm:$0xff]   ;;  %v4074_v35 = vld [vmem:[%s5409_s0 + $0x1d0] ss:$72 sps:$4 sm:$0xff]   ;;  %v4079_v37 = vld [vmem:[%s5409_s0 + $0x25c] ss:$72 sps:$4 sm:$0xff]  }
  0x55   :  { %3494 = vmatprep.subr.bf16.mxu1 %v4015_v42  ;;  %3558 = vmatprep.subr.bf16.mxu0 %v4017_v44  ;;  %v4105_v42 = vld [vmem:[%s5410_s1 + $0x2f0] sm:$0xff]   ;;  %v4084_v44 = vld [vmem:[%s5409_s0 + $0x260] ss:$72 sps:$4 sm:$0xff]  }
  0x58   :  { %3495 = vmatpush3.bf16.msra.mxu1 %v4016_v43  ;;  %3559 = vmatpush3.bf16.msra.mxu0 %v4018_v45  ;;  %v4083_v43 = vld [vmem:[%s5409_s0 + $0x258] ss:$72 sps:$4 sm:$0xff]   ;;  %v4106_v45 = vld [vmem:[%s5410_s1 + $0x2b0] sm:$0xff]  }
  0x59   :  { %3496 = vmatprep.subr.bf16.mxu1 %v4025_v50  ;;  %3560 = vmatprep.subr.bf16.mxu0 %v4027_v52  ;;  %v4115_v50 = vld [vmem:[%s5410_s1 + $0x2f8] sm:$0xff]  }
  0x5a   :  { %2189 = vmatmul.mubr.bf16.gmra.mrb[28].mxu1 %v3993_v28  ;;  %2286 = vmatmul.mubr.bf16.gmra.mrb[28].mxu0 %v3994_v31  ;;  %v4069_v28 = vld [vmem:[%s5409_s0 + $0x1cc] ss:$72 sps:$4 sm:$0xff]   ;;  %v4086_v31 = vld [vmem:[%s5410_s1 + $0x2a0] sm:$0xff]   ;;  %v4117_v52 = vld [vmem:[%s5410_s1 + $0x378] sm:$0xff]  }
  0x5b   :  { %2196 = vmatprep.mubr.bf16.mxu1 %v3999_v32  ;;  %2293 = vmatprep.mubr.bf16.mxu0 %v4001_v33  ;;  %v4087_v32 = vld [vmem:[%s5410_s1 + $0x360] sm:$0xff]  }
  0x5c   :  { %3497 = vmatpush3.bf16.msra.mxu1 %v4026_v51  ;;  %3561 = vmatpush3.bf16.msra.mxu0 %v4028_v53  ;;  %v4088_v33 = vld [vmem:[%s5410_s1 + $0x320] sm:$0xff]   ;;  %v4116_v51 = vld [vmem:[%s5410_s1 + $0x2b8] sm:$0xff]  }
  0x5d   :  { %3498 = vmatprep.subr.bf16.mxu1 %v4035_v56  ;;  %3562 = vmatprep.subr.bf16.mxu0 %v4037_v60  ;;  %v4118_v53 = vld [vmem:[%s5410_s1 + $0x338] sm:$0xff]  }
  0x5e   :  { %v4099_v56 = vld [vmem:[%s5409_s0 + $0x37c] ss:$72 sps:$4 sm:$0xff]   ;;  %v4103_v60 = vld [vmem:[%s5409_s0 + $0x378] ss:$72 sps:$4 sm:$0xff]  }
  0x60   :  { %3499 = vmatpush3.bf16.msra.mxu1 %v4036_v59  ;;  %3563 = vmatpush3.bf16.msra.mxu0 %v4038_v61  ;;  %v4127_v59 = vld [vmem:[%s5410_s1 + $0x440] sm:$0xff]  }
  0x61   :  { %3612 = vmatprep.subr.bf16.mxu1 %v4045_v62  ;;  %3676 = vmatprep.subr.bf16.mxu0 %v4047_v1  ;;  %v4104_v61 = vld [vmem:[%s5409_s0 + $0x380] ss:$72 sps:$4 sm:$0xff]   ;;  %v4109_v62 = vld [vmem:[%s5409_s0 + $0x40c] ss:$72 sps:$4 sm:$0xff]   ;;  %v4114_v1 = vld [vmem:[%s5409_s0 + $0x410] ss:$72 sps:$4 sm:$0xff]  }
  0x62   :  { %2197 = vmatmul.mubr.bf16.gmra.mrb[32].mxu1 %v4003_v38  ;;  %2294 = vmatmul.mubr.bf16.gmra.mrb[32].mxu0 %v4004_v39  ;;  %v4081_v38 = vld [vmem:[%s5409_s0 + $0x264] ss:$72 sps:$4 sm:$0xff]  }
  0x63   :  { %2204 = vmatprep.mubr.bf16.mxu1 %v4009_v40  ;;  %2301 = vmatprep.mubr.bf16.mxu0 %v4011_v41  ;;  %v4096_v39 = vld [vmem:[%s5410_s1 + $0x2a8] sm:$0xff]  }
  0x64   :  { %v4097_v40 = vld [vmem:[%s5410_s1 + $0x368] sm:$0xff]  }
  0x65   :  { %v4098_v41 = vld [vmem:[%s5410_s1 + $0x328] sm:$0xff]  }
  0x6a   :  { %2205 = vmatmul.mubr.bf16.gmra.mrb[36].mxu1 %v4013_v46  ;;  %2302 = vmatmul.mubr.bf16.gmra.mrb[36].mxu0 %v4014_v47  ;;  %v4089_v46 = vld [vmem:[%s5409_s0 + $0x2ec] ss:$72 sps:$4 sm:$0xff]  }
  0x6b   :  { %2212 = vmatprep.mubr.bf16.mxu1 %v4019_v48  ;;  %2309 = vmatprep.mubr.bf16.mxu0 %v4021_v49  ;;  %v4107_v47 = vld [vmem:[%s5410_s1 + $0x370] sm:$0xff]  }
  0x6c   :  { %v4108_v48 = vld [vmem:[%s5410_s1 + $0x330] sm:$0xff]  }
  0x6d   :  { %v4091_v49 = vld [vmem:[%s5409_s0 + $0x2f4] ss:$72 sps:$4 sm:$0xff]  }
  0x72   :  { %2213 = vmatmul.mubr.bf16.gmra.mrb[40].mxu1 %v4023_v54  ;;  %2310 = vmatmul.mubr.bf16.gmra.mrb[40].mxu0 %v4024_v55  ;;  %v4093_v54 = vld [vmem:[%s5409_s0 + $0x2e8] ss:$72 sps:$4 sm:$0xff]  }
  0x73   :  { %2220 = vmatprep.mubr.bf16.mxu1 %v4029_v57  ;;  %2317 = vmatprep.mubr.bf16.mxu0 %v4031_v58  ;;  %v4094_v55 = vld [vmem:[%s5409_s0 + $0x2f0] ss:$72 sps:$4 sm:$0xff]   ;;  %v4101_v57 = vld [vmem:[%s5409_s0 + $0x384] ss:$72 sps:$4 sm:$0xff]  }
  0x74   :  { %v4125_v58 = vld [vmem:[%s5410_s1 + $0x3c0] sm:$0xff]  }
  0x7a   :  { %2221 = vmatmul.mubr.bf16.gmra.mrb[44].mxu1 %v4033_v63  ;;  %2318 = vmatmul.mubr.bf16.gmra.mrb[44].mxu0 %v4034_v0  ;;  %v4111_v63 = vld [vmem:[%s5409_s0 + $0x414] ss:$72 sps:$4 sm:$0xff]   ;;  %v4113_v0 = vld [vmem:[%s5409_s0 + $0x408] ss:$72 sps:$4 sm:$0xff]  }
  0x7b   :  { %2358 = vmatprep.mubr.bf16.mxu1 %v4041_v2  ;;  %2455 = vmatprep.mubr.bf16.mxu0 %v4044_v3  ;;  %v4121_v2 = vld [vmem:[%s5409_s0 + $0x2c] ss:$72 sps:$4 sm:$0xff]  }
  0x7c   :  { %v4124_v3 = vld [vmem:[%s5409_s0 + $0x34] ss:$72 sps:$4 sm:$0xff]  }
  0x82   :  { %2359 = vmatmul.mubr.bf16.vlgmr.msra.gmra.mrb[48].mxu1 %v4039_v4  ;;  %2456 = vmatmul.mubr.bf16.vlgmr.msra.gmra.mrb[48].mxu0 %v4042_v5  ;;  %v4119_v4 = vld [vmem:[%s5409_s0 + $0x28] ss:$72 sps:$4 sm:$0xff]  }
  0x83   :  { %3613 = vmatpush3.bf16.msra.mxu1 %v4046_v6  ;;  %3677 = vmatpush3.bf16.msra.mxu0 %v4048_v7  ;;  %v4122_v5 = vld [vmem:[%s5409_s0 + $0x30] ss:$72 sps:$4 sm:$0xff]   ;;  %v4126_v6 = vld [vmem:[%s5410_s1 + $0x380] sm:$0xff]  }
  0x84   :  { %2366 = vmatprep.mubr.bf16.mxu1 %v4049_v8  ;;  %2463 = vmatprep.mubr.bf16.mxu0 %v4051_v9  ;;  %v4128_v7 = vld [vmem:[%s5410_s1 + $0x400] sm:$0xff]  }
  0x85   :  { %3614 = vmatprep.subr.bf16.mxu1 %v4055_v10  ;;  %3678 = vmatprep.subr.bf16.mxu0 %v4057_v12  ;;  %v4129_v8 = vld [vmem:[%s5409_s0 + $0xbc] ss:$72 sps:$4 sm:$0xff]   ;;  %v4135_v10 = vld [vmem:[%s5410_s1 + $0x3c8] sm:$0xff]  }
  0x86   :  { %v4131_v9 = vld [vmem:[%s5409_s0 + $0xc4] ss:$72 sps:$4 sm:$0xff]  }
  0x87   :  { %3615 = vmatpush3.bf16.msra.mxu1 %v4056_v11  ;;  %3679 = vmatpush3.bf16.msra.mxu0 %v4058_v13  ;;  %v4137_v11 = vld [vmem:[%s5410_s1 + $0x448] sm:$0xff]  }
  0x88   :  { %3616 = vmatprep.subr.bf16.mxu1 %v4065_v14  ;;  %3680 = vmatprep.subr.bf16.mxu0 %v4067_v17  ;;  %v4136_v12 = vld [vmem:[%s5410_s1 + $0x388] sm:$0xff]   ;;  %v4145_v14 = vld [vmem:[%s5410_s1 + $0x3d0] sm:$0xff]  }
  0x89   :  { %v4138_v13 = vld [vmem:[%s5410_s1 + $0x408] sm:$0xff]   ;;  %v4147_v17 = vld [vmem:[%s5410_s1 + $0x450] sm:$0xff]  }
  0x8a   :  { %2367 = vmatmul.mubr.bf16.gmra.mrb[52].mxu1 %v4053_v15  ;;  %2464 = vmatmul.mubr.bf16.gmra.mrb[52].mxu0 %v4054_v16  ;;  %v4133_v15 = vld [vmem:[%s5409_s0 + $0xb8] ss:$72 sps:$4 sm:$0xff]  }
  0x8b   :  { %2374 = vmatprep.mubr.bf16.mxu1 %v4059_v18  ;;  %2471 = vmatprep.mubr.bf16.mxu0 %v4061_v19  ;;  %v4134_v16 = vld [vmem:[%s5409_s0 + $0xc0] ss:$72 sps:$4 sm:$0xff]   ;;  %v4139_v18 = vld [vmem:[%s5409_s0 + $0x14c] ss:$72 sps:$4 sm:$0xff]  }
  0x8c   :  { %3617 = vmatpush3.bf16.msra.mxu1 %v4066_v20  ;;  %3681 = vmatpush3.bf16.msra.mxu0 %v4068_v21  ;;  %v4141_v19 = vld [vmem:[%s5409_s0 + $0x154] ss:$72 sps:$4 sm:$0xff]  }
  0x8d   :  { %3618 = vmatprep.subr.bf16.mxu1 %v4075_v22  ;;  %3682 = vmatprep.subr.bf16.mxu0 %v4077_v23  ;;  %v4146_v20 = vld [vmem:[%s5410_s1 + $0x390] sm:$0xff]   ;;  %v4155_v22 = vld [vmem:[%s5410_s1 + $0x3d8] sm:$0xff]  }
  0x8e   :  { %v4148_v21 = vld [vmem:[%s5410_s1 + $0x410] sm:$0xff]   ;;  %v4157_v23 = vld [vmem:[%s5410_s1 + $0x458] sm:$0xff]  }
  0x90   :  { %3619 = vmatpush3.bf16.msra.mxu1 %v4076_v26  ;;  %3683 = vmatpush3.bf16.msra.mxu0 %v4078_v27  ;;  %v4143_v26 = vld [vmem:[%s5409_s0 + $0x148] ss:$72 sps:$4 sm:$0xff]  }
  0x91   :  { %3620 = vmatprep.subr.bf16.mxu1 %v4085_v30  ;;  %3684 = vmatprep.subr.bf16.mxu0 %v4087_v32  ;;  %v4144_v27 = vld [vmem:[%s5409_s0 + $0x150] ss:$72 sps:$4 sm:$0xff]   ;;  %v4149_v30 = vld [vmem:[%s5409_s0 + $0x1dc] ss:$72 sps:$4 sm:$0xff]  }
  0x92   :  { %2375 = vmatmul.mubr.bf16.gmra.mrb[56].mxu1 %v4063_v24  ;;  %2472 = vmatmul.mubr.bf16.gmra.mrb[56].mxu0 %v4064_v25  ;;  %v4156_v24 = vld [vmem:[%s5410_s1 + $0x398] sm:$0xff]   ;;  %v4166_v32 = vld [vmem:[%s5410_s1 + $0x3a0] sm:$0xff]  }
  0x93   :  { %2382 = vmatprep.mubr.bf16.mxu1 %v4069_v28  ;;  %2479 = vmatprep.mubr.bf16.mxu0 %v4071_v29  ;;  %v4158_v25 = vld [vmem:[%s5410_s1 + $0x418] sm:$0xff]   ;;  %v4165_v28 = vld [vmem:[%s5410_s1 + $0x3e0] sm:$0xff]  }
  0x94   :  { %3621 = vmatpush3.bf16.msra.mxu1 %v4086_v31  ;;  %3685 = vmatpush3.bf16.msra.mxu0 %v4088_v33  ;;  %v4167_v29 = vld [vmem:[%s5410_s1 + $0x460] sm:$0xff]  }
  0x95   :  { %3622 = vmatprep.subr.bf16.mxu1 %v4095_v36  ;;  %3686 = vmatprep.subr.bf16.mxu0 %v4097_v40  ;;  %v4151_v31 = vld [vmem:[%s5409_s0 + $0x1e4] ss:$72 sps:$4 sm:$0xff]   ;;  %v4185_v40 = vld [vmem:[%s5410_s1 + $0x3f0] sm:$0xff]  }
  0x96   :  { %v4168_v33 = vld [vmem:[%s5410_s1 + $0x420] sm:$0xff]   ;;  %v4176_v36 = vld [vmem:[%s5410_s1 + $0x3a8] sm:$0xff]  }
  0x98   :  { %3623 = vmatpush3.bf16.msra.mxu1 %v4096_v39  ;;  %3687 = vmatpush3.bf16.msra.mxu0 %v4098_v41  ;;  %v4154_v39 = vld [vmem:[%s5409_s0 + $0x1e0] ss:$72 sps:$4 sm:$0xff]   ;;  %v4159_v41 = vld [vmem:[%s5409_s0 + $0x26c] ss:$72 sps:$4 sm:$0xff]  }
  0x99   :  { %3624 = vmatprep.subr.bf16.mxu1 %v4105_v42  ;;  %3688 = vmatprep.subr.bf16.mxu0 %v4107_v47  ;;  %v4187_v42 = vld [vmem:[%s5410_s1 + $0x470] sm:$0xff]   ;;  %v4197_v47 = vld [vmem:[%s5410_s1 + $0x478] sm:$0xff]  }
  0x9a   :  { %2383 = vmatmul.mubr.bf16.gmra.mrb[60].mxu1 %v4073_v34  ;;  %2480 = vmatmul.mubr.bf16.gmra.mrb[60].mxu0 %v4074_v35  ;;  %v4175_v34 = vld [vmem:[%s5410_s1 + $0x3e8] sm:$0xff]  }
  0x9b   :  { %2390 = vmatprep.mubr.bf16.mxu1 %v4079_v37  ;;  %2487 = vmatprep.mubr.bf16.mxu0 %v4081_v38  ;;  %v4177_v35 = vld [vmem:[%s5410_s1 + $0x468] sm:$0xff]   ;;  %v4153_v38 = vld [vmem:[%s5409_s0 + $0x1d8] ss:$72 sps:$4 sm:$0xff]  }
  0x9c   :  { %3625 = vmatpush3.bf16.msra.mxu1 %v4106_v45  ;;  %3689 = vmatpush3.bf16.msra.mxu0 %v4108_v48  ;;  %v4178_v37 = vld [vmem:[%s5410_s1 + $0x428] sm:$0xff]   ;;  %v4188_v45 = vld [vmem:[%s5410_s1 + $0x430] sm:$0xff]   ;;  %v4196_v48 = vld [vmem:[%s5410_s1 + $0x3b8] sm:$0xff]  }
  0x9d   :  { %3626 = vmatprep.subr.bf16.mxu1 %v4115_v50  ;;  %3690 = vmatprep.subr.bf16.mxu0 %v4117_v52  ;;  %v4163_v50 = vld [vmem:[%s5409_s0 + $0x268] ss:$72 sps:$4 sm:$0xff]   ;;  %v4169_v52 = vld [vmem:[%s5409_s0 + $0x2fc] ss:$72 sps:$4 sm:$0xff]  }
  0xa0   :  { %3627 = vmatpush3.bf16.msra.mxu1 %v4116_v51  ;;  %3691 = vmatpush3.bf16.msra.mxu0 %v4118_v53  ;;  %v4164_v51 = vld [vmem:[%s5409_s0 + $0x270] ss:$72 sps:$4 sm:$0xff]   ;;  %v4171_v53 = vld [vmem:[%s5409_s0 + $0x304] ss:$72 sps:$4 sm:$0xff]  }
  0xa1   :  { %3740 = vmatprep.subr.bf16.mxu1 %v4125_v58  ;;  %3804 = vmatprep.subr.bf16.mxu0 %v4127_v59  ;;  %v4183_v58 = vld [vmem:[%s5409_s0 + $0x388] ss:$72 sps:$4 sm:$0xff]  }
  0xa2   :  { %2391 = vmatmul.mubr.bf16.gmra.mrb[64].mxu1 %v4083_v43  ;;  %2488 = vmatmul.mubr.bf16.gmra.mrb[64].mxu0 %v4084_v44  ;;  %v4161_v43 = vld [vmem:[%s5409_s0 + $0x274] ss:$72 sps:$4 sm:$0xff]   ;;  %v4184_v59 = vld [vmem:[%s5409_s0 + $0x390] ss:$72 sps:$4 sm:$0xff]  }
  0xa3   :  { %2398 = vmatprep.mubr.bf16.mxu1 %v4089_v46  ;;  %2495 = vmatprep.mubr.bf16.mxu0 %v4091_v49  ;;  %v4186_v44 = vld [vmem:[%s5410_s1 + $0x3b0] sm:$0xff]   ;;  %v4195_v46 = vld [vmem:[%s5410_s1 + $0x3f8] sm:$0xff]  }
  0xa4   :  { %v4198_v49 = vld [vmem:[%s5410_s1 + $0x438] sm:$0xff]  }
  0xaa   :  { %2399 = vmatmul.mubr.bf16.gmra.mrb[68].mxu1 %v4093_v54  ;;  %2496 = vmatmul.mubr.bf16.gmra.mrb[68].mxu0 %v4094_v55  ;;  %v4173_v54 = vld [vmem:[%s5409_s0 + $0x2f8] ss:$72 sps:$4 sm:$0xff]  }
  0xab   :  { %2406 = vmatprep.mubr.bf16.mxu1 %v4099_v56  ;;  %2503 = vmatprep.mubr.bf16.mxu0 %v4101_v57  ;;  %v4174_v55 = vld [vmem:[%s5409_s0 + $0x300] ss:$72 sps:$4 sm:$0xff]   ;;  %v4179_v56 = vld [vmem:[%s5409_s0 + $0x38c] ss:$72 sps:$4 sm:$0xff]  }
  0xac   :  { %v4181_v57 = vld [vmem:[%s5409_s0 + $0x394] ss:$72 sps:$4 sm:$0xff]  }
  0xb2   :  { %2407 = vmatmul.mubr.bf16.gmra.mrb[72].mxu1 %v4103_v60  ;;  %2504 = vmatmul.mubr.bf16.gmra.mrb[72].mxu0 %v4104_v61  ;;  %v4189_v60 = vld [vmem:[%s5409_s0 + $0x41c] ss:$72 sps:$4 sm:$0xff]  }
  0xb3   :  { %2414 = vmatprep.mubr.bf16.mxu1 %v4109_v62  ;;  %2511 = vmatprep.mubr.bf16.mxu0 %v4111_v63  ;;  %v4191_v61 = vld [vmem:[%s5409_s0 + $0x424] ss:$72 sps:$4 sm:$0xff]  }
  0xba   :  { %2415 = vmatmul.mubr.bf16.gmra.mrb[76].mxu1 %v4113_v0  ;;  %2512 = vmatmul.mubr.bf16.gmra.mrb[76].mxu0 %v4114_v1 }
  0xbb   :  { %2552 = vmatprep.mubr.bf16.mxu1 %v4121_v2  ;;  %2649 = vmatprep.mubr.bf16.mxu0 %v4124_v3 }
  0xc2   :  { %2553 = vmatmul.mubr.bf16.vlgmr.msra.gmra.mrb[80].mxu1 %v4119_v4  ;;  %2650 = vmatmul.mubr.bf16.vlgmr.msra.gmra.mrb[80].mxu0 %v4122_v5 }
  0xc3   :  { %3741 = vmatpush3.bf16.msra.mxu1 %v4126_v6  ;;  %3805 = vmatpush3.bf16.msra.mxu0 %v4128_v7 }
  0xc4   :  { %2560 = vmatprep.mubr.bf16.mxu1 %v4129_v8  ;;  %2657 = vmatprep.mubr.bf16.mxu0 %v4131_v9 }
  0xc5   :  { %3742 = vmatprep.subr.bf16.mxu1 %v4135_v10  ;;  %3806 = vmatprep.subr.bf16.mxu0 %v4137_v11 }
  0xc7   :  { %3743 = vmatpush3.bf16.msra.mxu1 %v4136_v12  ;;  %3807 = vmatpush3.bf16.msra.mxu0 %v4138_v13 }
  0xc8   :  { %3744 = vmatprep.subr.bf16.mxu1 %v4145_v14  ;;  %3808 = vmatprep.subr.bf16.mxu0 %v4147_v17 }
  0xca   :  { %2561 = vmatmul.mubr.bf16.gmra.mrb[84].mxu1 %v4133_v15  ;;  %2658 = vmatmul.mubr.bf16.gmra.mrb[84].mxu0 %v4134_v16 }
  0xcb   :  { %2568 = vmatprep.mubr.bf16.mxu1 %v4139_v18  ;;  %2665 = vmatprep.mubr.bf16.mxu0 %v4141_v19 }
  0xcc   :  { %3745 = vmatpush3.bf16.msra.mxu1 %v4146_v20  ;;  %3809 = vmatpush3.bf16.msra.mxu0 %v4148_v21 }
  0xcd   :  { %3746 = vmatprep.subr.bf16.mxu1 %v4155_v22  ;;  %3810 = vmatprep.subr.bf16.mxu0 %v4157_v23 }
  0xd0   :  { %3747 = vmatpush3.bf16.msra.mxu1 %v4156_v24  ;;  %3811 = vmatpush3.bf16.msra.mxu0 %v4158_v25 }
  0xd1   :  { %3748 = vmatprep.subr.bf16.mxu1 %v4165_v28  ;;  %3812 = vmatprep.subr.bf16.mxu0 %v4167_v29 }
  0xd2   :  { %2569 = vmatmul.mubr.bf16.gmra.mrb[88].mxu1 %v4143_v26  ;;  %2666 = vmatmul.mubr.bf16.gmra.mrb[88].mxu0 %v4144_v27 }
  0xd3   :  { %2576 = vmatprep.mubr.bf16.mxu1 %v4149_v30  ;;  %2673 = vmatprep.mubr.bf16.mxu0 %v4151_v31 }
  0xd4   :  { %3749 = vmatpush3.bf16.msra.mxu1 %v4166_v32  ;;  %3813 = vmatpush3.bf16.msra.mxu0 %v4168_v33 }
  0xd5   :  { %3750 = vmatprep.subr.bf16.mxu1 %v4175_v34  ;;  %3814 = vmatprep.subr.bf16.mxu0 %v4177_v35 }
  0xd8   :  { %3751 = vmatpush3.bf16.msra.mxu1 %v4176_v36  ;;  %3815 = vmatpush3.bf16.msra.mxu0 %v4178_v37 }
  0xd9   :  { %3752 = vmatprep.subr.bf16.mxu1 %v4185_v40  ;;  %3816 = vmatprep.subr.bf16.mxu0 %v4187_v42 }
  0xda   :  { %2577 = vmatmul.mubr.bf16.gmra.mrb[92].mxu1 %v4153_v38  ;;  %2674 = vmatmul.mubr.bf16.gmra.mrb[92].mxu0 %v4154_v39 }
  0xdb   :  { %2584 = vmatprep.mubr.bf16.mxu1 %v4159_v41  ;;  %2681 = vmatprep.mubr.bf16.mxu0 %v4161_v43 }
  0xdc   :  { %3753 = vmatpush3.bf16.msra.mxu1 %v4186_v44  ;;  %3817 = vmatpush3.bf16.msra.mxu0 %v4188_v45 }
  0xdd   :  { %3754 = vmatprep.subr.bf16.mxu1 %v4195_v46  ;;  %3818 = vmatprep.subr.bf16.mxu0 %v4197_v47 }
  0xe0   :  { %3755 = vmatpush3.bf16.msra.mxu1 %v4196_v48  ;;  %3819 = vmatpush3.bf16.msra.mxu0 %v4198_v49 }
  0xe2   :  { %2585 = vmatmul.mubr.bf16.gmra.mrb[96].mxu1 %v4163_v50  ;;  %2682 = vmatmul.mubr.bf16.gmra.mrb[96].mxu0 %v4164_v51 }
  0xe3   :  { %2592 = vmatprep.mubr.bf16.mxu1 %v4169_v52  ;;  %2689 = vmatprep.mubr.bf16.mxu0 %v4171_v53 }
  0xea   :  { %2593 = vmatmul.mubr.bf16.gmra.mrb[100].mxu1 %v4173_v54  ;;  %2690 = vmatmul.mubr.bf16.gmra.mrb[100].mxu0 %v4174_v55 }
  0xeb   :  { %2600 = vmatprep.mubr.bf16.mxu1 %v4179_v56  ;;  %2697 = vmatprep.mubr.bf16.mxu0 %v4181_v57 }
  0xec   :  { %9 = vsyncpa [#allocation3], 0  ;;  %v4193_v2 = vld [vmem:[%s5409_s0 + $0x418] ss:$72 sps:$4 sm:$0xff]   ;;  %v4201_v8 = vld [vmem:[%s5409_s0 + $0x3c] ss:$72 sps:$4 sm:$0xff]  }
  0xed   :  { %v4194_v3 = vld [vmem:[%s5409_s0 + $0x420] ss:$72 sps:$4 sm:$0xff]   ;;  %v4204_v9 = vld [vmem:[%s5409_s0 + $0x44] ss:$72 sps:$4 sm:$0xff]   ;;  %v4207_v25 = vld [vmem:[%s5409_s0 + $0xd4] ss:$72 sps:$4 sm:$0xff]  }
  0xee   :  { %v4199_v18 = vld [vmem:[%s5409_s0 + $0x38] ss:$72 sps:$4 sm:$0xff]   ;;  %v4205_v24 = vld [vmem:[%s5409_s0 + $0xcc] ss:$72 sps:$4 sm:$0xff]   ;;  %v4209_v34 = vld [vmem:[%s5409_s0 + $0xc8] ss:$72 sps:$4 sm:$0xff]  }
  0xef   :  { %v4202_v19 = vld [vmem:[%s5409_s0 + $0x40] ss:$72 sps:$4 sm:$0xff]   ;;  %v4210_v35 = vld [vmem:[%s5409_s0 + $0xd0] ss:$72 sps:$4 sm:$0xff]   ;;  %v4211_v40 = vld [vmem:[%s5409_s0 + $0x15c] ss:$72 sps:$4 sm:$0xff]  }
  0xf0   :  { %v4213_v41 = vld [vmem:[%s5409_s0 + $0x164] ss:$72 sps:$4 sm:$0xff]   ;;  %v4215_v50 = vld [vmem:[%s5409_s0 + $0x158] ss:$72 sps:$4 sm:$0xff]   ;;  %v4219_v57 = vld [vmem:[%s5409_s0 + $0x1f4] ss:$72 sps:$4 sm:$0xff]  }
  0xf1   :  { %v4216_v51 = vld [vmem:[%s5409_s0 + $0x160] ss:$72 sps:$4 sm:$0xff]   ;;  %v4217_v56 = vld [vmem:[%s5409_s0 + $0x1ec] ss:$72 sps:$4 sm:$0xff]  }
  0xf2   :  { %2601 = vmatmul.mubr.bf16.gmra.mrb[104].mxu1 %v4183_v58  ;;  %2698 = vmatmul.mubr.bf16.gmra.mrb[104].mxu0 %v4184_v59 }
  0xf3   :  { %2608 = vmatprep.mubr.bf16.mxu1 %v4189_v60  ;;  %2705 = vmatprep.mubr.bf16.mxu0 %v4191_v61 }
  0xf5   :  { %v3308_v62 = vpop.f32.mrb[0].mxu0  ;;  %v3332_v63 = vpop.f32.mrb[0].mxu1 }
  0xf6   :  { %v3309_v0 = vpop.f32.mrb[1].mxu0  ;;  %v3333_v1 = vpop.f32.mrb[1].mxu1 }
  0xf7   :  { %v5067_v4 = vadd.f32 %v3309_v0, %v3308_v62  ;;  %v5069_v5 = vadd.f32 %v3333_v1, %v3332_v63  ;;  %v3311_v6 = vpop.f32.mrb[2].mxu0  ;;  %v3335_v7 = vpop.f32.mrb[2].mxu1 }
  0xf8   :  { %v3312_v10 = vpop.f32.mrb[3].mxu0  ;;  %v3336_v11 = vpop.f32.mrb[3].mxu1 }
  0xf9   :  { %v5077_v12 = vadd.f32 %v3312_v10, %v3311_v6  ;;  %v5079_v13 = vadd.f32 %v3336_v11, %v3335_v7  ;;  %v4223_v10 = vld [vmem:[%s5409_s0 + $0x27c] ss:$72 sps:$4 sm:$0xff]  }
  0xfa   :  { %2609 = vmatmul.mubr.bf16.gmra.mrb[108].mxu1 %v4193_v2  ;;  %2706 = vmatmul.mubr.bf16.gmra.mrb[108].mxu0 %v4194_v3  ;;  %v4221_v2 = vld [vmem:[%s5409_s0 + $0x1e8] ss:$72 sps:$4 sm:$0xff]   ;;  %v4225_v11 = vld [vmem:[%s5409_s0 + $0x284] ss:$72 sps:$4 sm:$0xff]  }
  0xfb   :  { %2746 = vmatprep.mubr.bf16.mxu1 %v4201_v8  ;;  %2843 = vmatprep.mubr.bf16.mxu0 %v4204_v9  ;;  %v4222_v3 = vld [vmem:[%s5409_s0 + $0x1f0] ss:$72 sps:$4 sm:$0xff]  }
  0xfd   :  { %v3314_v14 = vpop.f32.mrb[4].mxu0  ;;  %v3338_v15 = vpop.f32.mrb[4].mxu1 }
  0xfe   :  { %v3315_v16 = vpop.f32.mrb[5].mxu0  ;;  %v3339_v17 = vpop.f32.mrb[5].mxu1 }
  0xff   :  { %v5087_v20 = vadd.f32 %v3315_v16, %v3314_v14  ;;  %v5089_v21 = vadd.f32 %v3339_v17, %v3338_v15  ;;  %v3317_v22 = vpop.f32.mrb[6].mxu0  ;;  %v3341_v23 = vpop.f32.mrb[6].mxu1 }
 0x100   :  { %v3318_v26 = vpop.f32.mrb[7].mxu0  ;;  %v3342_v27 = vpop.f32.mrb[7].mxu1 }
 0x101   :  { %v5097_v28 = vadd.f32 %v3318_v26, %v3317_v22  ;;  %v5099_v29 = vadd.f32 %v3342_v27, %v3341_v23 }
 0x102   :  { %2747 = vmatmul.mubr.bf16.vlgmr.msra.gmra.mrb[112].mxu1 %v4199_v18  ;;  %2844 = vmatmul.mubr.bf16.vlgmr.msra.gmra.mrb[112].mxu0 %v4202_v19 }
 0x103   :  { %2754 = vmatprep.mubr.bf16.mxu1 %v4205_v24  ;;  %2851 = vmatprep.mubr.bf16.mxu0 %v4207_v25 }
 0x105   :  { %v3320_v30 = vpop.f32.mrb[8].mxu0  ;;  %v3344_v31 = vpop.f32.mrb[8].mxu1 }
 0x106   :  { %v3321_v32 = vpop.f32.mrb[9].mxu0  ;;  %v3345_v33 = vpop.f32.mrb[9].mxu1 }
 0x107   :  { %v5107_v36 = vadd.f32 %v3321_v32, %v3320_v30  ;;  %v5109_v37 = vadd.f32 %v3345_v33, %v3344_v31  ;;  %v3323_v38 = vpop.f32.mrb[10].mxu0  ;;  %v3347_v39 = vpop.f32.mrb[10].mxu1  ;;  %v4228_v30 = vld [vmem:[%s5409_s0 + $0x280] ss:$72 sps:$4 sm:$0xff]  }
 0x108   :  { %v3324_v42 = vpop.f32.mrb[11].mxu0  ;;  %v3348_v43 = vpop.f32.mrb[11].mxu1 }
 0x109   :  { %v5117_v44 = vadd.f32 %v3324_v42, %v3323_v38  ;;  %v5119_v45 = vadd.f32 %v3348_v43, %v3347_v39 }
 0x10a   :  { %2755 = vmatmul.mubr.bf16.gmra.mrb[116].mxu1 %v4209_v34  ;;  %2852 = vmatmul.mubr.bf16.gmra.mrb[116].mxu0 %v4210_v35  ;;  %v4229_v34 = vld [vmem:[%s5409_s0 + $0x30c] ss:$72 sps:$4 sm:$0xff]  }
 0x10b   :  { %2762 = vmatprep.mubr.bf16.mxu1 %v4211_v40  ;;  %2859 = vmatprep.mubr.bf16.mxu0 %v4213_v41  ;;  %v4231_v35 = vld [vmem:[%s5409_s0 + $0x314] ss:$72 sps:$4 sm:$0xff]  }
 0x10d   :  { %v3326_v46 = vpop.f32.mrb[12].mxu0  ;;  %v3350_v47 = vpop.f32.mrb[12].mxu1 }
 0x10e   :  { %v3327_v48 = vpop.f32.mrb[13].mxu0  ;;  %v3351_v49 = vpop.f32.mrb[13].mxu1 }
 0x10f   :  { %v5127_v52 = vadd.f32 %v3327_v48, %v3326_v46  ;;  %v5129_v53 = vadd.f32 %v3351_v49, %v3350_v47  ;;  %v3329_v54 = vpop.f32.mrb[14].mxu0  ;;  %v3353_v55 = vpop.f32.mrb[14].mxu1 }
 0x110   :  { %v3330_v58 = vpop.f32.mrb[15].mxu0  ;;  %v3354_v59 = vpop.f32.mrb[15].mxu1 }
 0x111   :  { %v5137_v60 = vadd.f32 %v3330_v58, %v3329_v54  ;;  %v5139_v61 = vadd.f32 %v3354_v59, %v3353_v55  ;;  %v4234_v54 = vld [vmem:[%s5409_s0 + $0x310] ss:$72 sps:$4 sm:$0xff]   ;;  %v4235_v58 = vld [vmem:[%s5409_s0 + $0x39c] ss:$72 sps:$4 sm:$0xff]  }
 0x112   :  { %2763 = vmatmul.mubr.bf16.gmra.mrb[120].mxu1 %v4215_v50  ;;  %2860 = vmatmul.mubr.bf16.gmra.mrb[120].mxu0 %v4216_v51  ;;  %v4237_v59 = vld [vmem:[%s5409_s0 + $0x3a4] ss:$72 sps:$4 sm:$0xff]  }
 0x113   :  { %2770 = vmatprep.mubr.bf16.mxu1 %v4217_v56  ;;  %2867 = vmatprep.mubr.bf16.mxu0 %v4219_v57 }
 0x115   :  { %v3372_v62 = vpop.f32.mrb[16].mxu1  ;;  %v3436_v63 = vpop.f32.mrb[16].mxu0 }
 0x116   :  { %v3373_v0 = vpop.f32.mrb[17].mxu1  ;;  %v3437_v1 = vpop.f32.mrb[17].mxu0 }
 0x117   :  { %v3374_v6 = vadd.f32 %v3373_v0, %v3372_v62  ;;  %v3438_v7 = vadd.f32 %v3437_v1, %v3436_v63  ;;  %v3375_v8 = vpop.f32.mrb[18].mxu1  ;;  %v3439_v9 = vpop.f32.mrb[18].mxu0 }
 0x118   :  { %v3376_v14 = vpop.f32.mrb[19].mxu1  ;;  %v3440_v15 = vpop.f32.mrb[19].mxu0 }
 0x119   :  { %v2167_v16 = vadd.f32 %v3374_v6, %v5067_v4  ;;  %v3377_v17 = vadd.f32 %v3376_v14, %v3375_v8  ;;  %v3441_v18 = vadd.f32 %v3440_v15, %v3439_v9  ;;  %v4227_v4 = vld [vmem:[%s5409_s0 + $0x278] ss:$72 sps:$4 sm:$0xff]  }
 0x11a   :  { %2771 = vmatmul.mubr.bf16.gmra.mrb[124].mxu1 %v4221_v2  ;;  %2868 = vmatmul.mubr.bf16.gmra.mrb[124].mxu0 %v4222_v3  ;;  %v4240_v14 = vld [vmem:[%s5409_s0 + $0x3a0] ss:$72 sps:$4 sm:$0xff]  }
 0x11b   :  { %v5154_v19 = vadd.f32 %v3438_v7, %v2167_v16  ;;  %v2170_v22 = vadd.f32 %v3377_v17, %v5077_v12  ;;  %2778 = vmatprep.mubr.bf16.mxu1 %v4223_v10  ;;  %2875 = vmatprep.mubr.bf16.mxu0 %v4225_v11 }
 0x11d   :  { %v5157_v23 = vadd.f32 %v3441_v18, %v2170_v22  ;;  %v3378_v24 = vpop.f32.mrb[20].mxu1  ;;  %v3442_v25 = vpop.f32.mrb[20].mxu0  ;;  %v4241_v18 = vld [vmem:[%s5409_s0 + $0x42c] ss:$72 sps:$4 sm:$0xff]  }
 0x11e   :  { %v3379_v26 = vpop.f32.mrb[21].mxu1  ;;  %v3443_v27 = vpop.f32.mrb[21].mxu0  ;;  %v4243_v22 = vld [vmem:[%s5409_s0 + $0x434] ss:$72 sps:$4 sm:$0xff]  }
 0x11f   :  { %v3380_v31 = vadd.f32 %v3379_v26, %v3378_v24  ;;  %v3444_v32 = vadd.f32 %v3443_v27, %v3442_v25  ;;  %v3381_v33 = vpop.f32.mrb[22].mxu1  ;;  %v3445_v12 = vpop.f32.mrb[22].mxu0 }
 0x120   :  { %v3382_v38 = vpop.f32.mrb[23].mxu1  ;;  %v3446_v39 = vpop.f32.mrb[23].mxu0 }
 0x121   :  { %v2175_v40 = vadd.f32 %v3380_v31, %v5087_v20  ;;  %v3383_v41 = vadd.f32 %v3382_v38, %v3381_v33  ;;  %v3447_v42 = vadd.f32 %v3446_v39, %v3445_v12  ;;  %v4233_v20 = vld [vmem:[%s5409_s0 + $0x308] ss:$72 sps:$4 sm:$0xff]  }
 0x122   :  { %2779 = vmatmul.mubr.bf16.gmra.mrb[128].mxu1 %v4227_v4  ;;  %2876 = vmatmul.mubr.bf16.gmra.mrb[128].mxu0 %v4228_v30  ;;  %v4246_v38 = vld [vmem:[%s5409_s0 + $0x430] ss:$72 sps:$4 sm:$0xff]  }
 0x123   :  { %v5172_v43 = vadd.f32 %v3444_v32, %v2175_v40  ;;  %v2178_v46 = vadd.f32 %v3383_v41, %v5097_v28  ;;  %2786 = vmatprep.mubr.bf16.mxu1 %v4229_v34  ;;  %2883 = vmatprep.mubr.bf16.mxu0 %v4231_v35 }
 0x125   :  { %v5175_v47 = vadd.f32 %v3447_v42, %v2178_v46  ;;  %v3384_v48 = vpop.f32.mrb[24].mxu1  ;;  %v3448_v49 = vpop.f32.mrb[24].mxu0 }
 0x126   :  { %v3385_v50 = vpop.f32.mrb[25].mxu1  ;;  %v3449_v51 = vpop.f32.mrb[25].mxu0 }
 0x127   :  { %v3386_v55 = vadd.f32 %v3385_v50, %v3384_v48  ;;  %v3450_v56 = vadd.f32 %v3449_v51, %v3448_v49  ;;  %v3387_v57 = vpop.f32.mrb[26].mxu1  ;;  %v3451_v28 = vpop.f32.mrb[26].mxu0 }
 0x128   :  { %v3388_v62 = vpop.f32.mrb[27].mxu1  ;;  %v3452_v63 = vpop.f32.mrb[27].mxu0 }
 0x129   :  { %v2183_v0 = vadd.f32 %v3386_v55, %v5107_v36  ;;  %v3389_v1 = vadd.f32 %v3388_v62, %v3387_v57  ;;  %v3453_v2 = vadd.f32 %v3452_v63, %v3451_v28  ;;  %v4239_v36 = vld [vmem:[%s5409_s0 + $0x398] ss:$72 sps:$4 sm:$0xff]  }
 0x12a   :  { %2787 = vmatmul.mubr.bf16.gmra.mrb[132].mxu1 %v4233_v20  ;;  %2884 = vmatmul.mubr.bf16.gmra.mrb[132].mxu0 %v4234_v54 }
 0x12b   :  { %v5190_v3 = vadd.f32 %v3450_v56, %v2183_v0  ;;  %v2186_v6 = vadd.f32 %v3389_v1, %v5117_v44  ;;  %2794 = vmatprep.mubr.bf16.mxu1 %v4235_v58  ;;  %2891 = vmatprep.mubr.bf16.mxu0 %v4237_v59 }
 0x12d   :  { %v5193_v7 = vadd.f32 %v3453_v2, %v2186_v6  ;;  %v3390_v8 = vpop.f32.mrb[28].mxu1  ;;  %v3454_v9 = vpop.f32.mrb[28].mxu0 }
 0x12e   :  { %v3391_v10 = vpop.f32.mrb[29].mxu1  ;;  %v3455_v11 = vpop.f32.mrb[29].mxu0 }
 0x12f   :  { %v3392_v15 = vadd.f32 %v3391_v10, %v3390_v8  ;;  %v3456_v16 = vadd.f32 %v3455_v11, %v3454_v9  ;;  %v3393_v17 = vpop.f32.mrb[30].mxu1  ;;  %v3457_v44 = vpop.f32.mrb[30].mxu0 }
 0x130   :  { %v3394_v24 = vpop.f32.mrb[31].mxu1  ;;  %v3458_v25 = vpop.f32.mrb[31].mxu0 }
 0x131   :  { %v2191_v26 = vadd.f32 %v3392_v15, %v5127_v52  ;;  %v3395_v27 = vadd.f32 %v3394_v24, %v3393_v17  ;;  %v3459_v4 = vadd.f32 %v3458_v25, %v3457_v44  ;;  %v4245_v52 = vld [vmem:[%s5409_s0 + $0x428] ss:$72 sps:$4 sm:$0xff]  }
 0x132   :  { %2795 = vmatmul.mubr.bf16.gmra.mrb[136].mxu1 %v4239_v36  ;;  %2892 = vmatmul.mubr.bf16.gmra.mrb[136].mxu0 %v4240_v14 }
 0x133   :  { %v5208_v30 = vadd.f32 %v3456_v16, %v2191_v26  ;;  %v2194_v31 = vadd.f32 %v3395_v27, %v5137_v60  ;;  %2802 = vmatprep.mubr.bf16.mxu1 %v4241_v18  ;;  %2899 = vmatprep.mubr.bf16.mxu0 %v4243_v22 }
 0x135   :  { %v5211_v32 = vadd.f32 %v3459_v4, %v2194_v31  ;;  %v3396_v33 = vpop.f32.mrb[32].mxu1  ;;  %v3460_v12 = vpop.f32.mrb[32].mxu0 }
 0x136   :  { %v3397_v34 = vpop.f32.mrb[33].mxu1  ;;  %v3461_v35 = vpop.f32.mrb[33].mxu0 }
 0x137   :  { %v3398_v39 = vadd.f32 %v3397_v34, %v3396_v33  ;;  %v3462_v40 = vadd.f32 %v3461_v35, %v3460_v12  ;;  %v3399_v41 = vpop.f32.mrb[34].mxu1  ;;  %v3463_v60 = vpop.f32.mrb[34].mxu0 }
 0x138   :  { %v3400_v42 = vpop.f32.mrb[35].mxu1  ;;  %v3464_v46 = vpop.f32.mrb[35].mxu0 }
 0x139   :  { %v2199_v48 = vadd.f32 %v3398_v39, %v5069_v5  ;;  %v3401_v49 = vadd.f32 %v3400_v42, %v3399_v41  ;;  %v3465_v50 = vadd.f32 %v3464_v46, %v3463_v60 }
 0x13a   :  { %2803 = vmatmul.mubr.bf16.gmra.mrb[140].mxu1 %v4245_v52  ;;  %2900 = vmatmul.mubr.bf16.gmra.mrb[140].mxu0 %v4246_v38 }
 0x13b   :  { %v5220_v51 = vadd.f32 %v3462_v40, %v2199_v48  ;;  %v2202_v20 = vadd.f32 %v3401_v49, %v5079_v13 }
 0x13d   :  { %v5223_v54 = vadd.f32 %v3465_v50, %v2202_v20  ;;  %v3402_v55 = vpop.f32.mrb[36].mxu1  ;;  %v3466_v56 = vpop.f32.mrb[36].mxu0 }
 0x13e   :  { %v3403_v57 = vpop.f32.mrb[37].mxu1  ;;  %v3467_v28 = vpop.f32.mrb[37].mxu0 }
 0x13f   :  { %v3404_v58 = vadd.f32 %v3403_v57, %v3402_v55  ;;  %v3468_v59 = vadd.f32 %v3467_v28, %v3466_v56  ;;  %v3405_v62 = vpop.f32.mrb[38].mxu1  ;;  %v3469_v63 = vpop.f32.mrb[38].mxu0 }
 0x140   :  { %v3406_v0 = vpop.f32.mrb[39].mxu1  ;;  %v3470_v5 = vpop.f32.mrb[39].mxu0 }
 0x141   :  { %v2207_v1 = vadd.f32 %v3404_v58, %v5089_v21  ;;  %v3407_v2 = vadd.f32 %v3406_v0, %v3405_v62  ;;  %v3471_v6 = vadd.f32 %v3470_v5, %v3469_v63 }
 0x143   :  { %v5226_v8 = vadd.f32 %v3468_v59, %v2207_v1  ;;  %v2210_v13 = vadd.f32 %v3407_v2, %v5099_v29 }
 0x145   :  { %v5229_v9 = vadd.f32 %v3471_v6, %v2210_v13  ;;  %v3408_v10 = vpop.f32.mrb[40].mxu1  ;;  %v3472_v11 = vpop.f32.mrb[40].mxu0 }
 0x146   :  { %v3409_v36 = vpop.f32.mrb[41].mxu1  ;;  %v3473_v14 = vpop.f32.mrb[41].mxu0 }
 0x147   :  { %v3410_v15 = vadd.f32 %v3409_v36, %v3408_v10  ;;  %v3474_v16 = vadd.f32 %v3473_v14, %v3472_v11  ;;  %v3411_v17 = vpop.f32.mrb[42].mxu1  ;;  %v3475_v44 = vpop.f32.mrb[42].mxu0 }
 0x148   :  { %v3412_v18 = vpop.f32.mrb[43].mxu1  ;;  %v3476_v22 = vpop.f32.mrb[43].mxu0 }
 0x149   :  { %v2215_v21 = vadd.f32 %v3410_v15, %v5109_v37  ;;  %v3413_v24 = vadd.f32 %v3412_v18, %v3411_v17  ;;  %v3477_v25 = vadd.f32 %v3476_v22, %v3475_v44 }
 0x14b   :  { %v5232_v26 = vadd.f32 %v3474_v16, %v2215_v21  ;;  %v2218_v29 = vadd.f32 %v3413_v24, %v5119_v45 }
 0x14d   :  { %v5235_v27 = vadd.f32 %v3477_v25, %v2218_v29  ;;  %v3414_v4 = vpop.f32.mrb[44].mxu1  ;;  %v3478_v31 = vpop.f32.mrb[44].mxu0 }
 0x14e   :  { %v3415_v33 = vpop.f32.mrb[45].mxu1  ;;  %v3479_v12 = vpop.f32.mrb[45].mxu0 }
 0x14f   :  { %v3416_v34 = vadd.f32 %v3415_v33, %v3414_v4  ;;  %v3480_v35 = vadd.f32 %v3479_v12, %v3478_v31  ;;  %v3417_v52 = vpop.f32.mrb[46].mxu1  ;;  %v3481_v38 = vpop.f32.mrb[46].mxu0 }
 0x150   :  { %v3418_v39 = vpop.f32.mrb[47].mxu1  ;;  %v3482_v40 = vpop.f32.mrb[47].mxu0 }
 0x151   :  { %v2223_v37 = vadd.f32 %v3416_v34, %v5129_v53  ;;  %v3419_v41 = vadd.f32 %v3418_v39, %v3417_v52  ;;  %v3483_v60 = vadd.f32 %v3482_v40, %v3481_v38 }
 0x153   :  { %v5238_v42 = vadd.f32 %v3480_v35, %v2223_v37  ;;  %v2226_v45 = vadd.f32 %v3419_v41, %v5139_v61 }
 0x155   :  { %v5241_v46 = vadd.f32 %v3483_v60, %v2226_v45  ;;  %v3500_v48 = vpop.f32.mrb[48].mxu1  ;;  %v3564_v49 = vpop.f32.mrb[48].mxu0 }
 0x156   :  { %v3501_v50 = vpop.f32.mrb[49].mxu1  ;;  %v3565_v20 = vpop.f32.mrb[49].mxu0 }
 0x157   :  { %v3502_v55 = vadd.f32 %v3501_v50, %v3500_v48  ;;  %v3566_v56 = vadd.f32 %v3565_v20, %v3564_v49  ;;  %v3503_v57 = vpop.f32.mrb[50].mxu1  ;;  %v3567_v28 = vpop.f32.mrb[50].mxu0 }
 0x158   :  { %v3504_v58 = vpop.f32.mrb[51].mxu1  ;;  %v3568_v59 = vpop.f32.mrb[51].mxu0 }
 0x159   :  { %v2361_v53 = vadd.f32 %v3502_v55, %v5154_v19  ;;  %v3505_v62 = vadd.f32 %v3504_v58, %v3503_v57  ;;  %v3569_v63 = vadd.f32 %v3568_v59, %v3567_v28 }
 0x15b   :  { %v5244_v0 = vadd.f32 %v3566_v56, %v2361_v53  ;;  %v2364_v61 = vadd.f32 %v3505_v62, %v5157_v23 }
 0x15d   :  { %v5247_v5 = vadd.f32 %v3569_v63, %v2364_v61  ;;  %v3506_v1 = vpop.f32.mrb[52].mxu1  ;;  %v3570_v2 = vpop.f32.mrb[52].mxu0 }
 0x15e   :  { %v3507_v6 = vpop.f32.mrb[53].mxu1  ;;  %v3571_v13 = vpop.f32.mrb[53].mxu0 }
 0x15f   :  { %v3508_v10 = vadd.f32 %v3507_v6, %v3506_v1  ;;  %v3572_v11 = vadd.f32 %v3571_v13, %v3570_v2  ;;  %v3509_v36 = vpop.f32.mrb[54].mxu1  ;;  %v3573_v14 = vpop.f32.mrb[54].mxu0 }
 0x160   :  { %v3510_v15 = vpop.f32.mrb[55].mxu1  ;;  %v3574_v16 = vpop.f32.mrb[55].mxu0 }
 0x161   :  { %v2369_v19 = vadd.f32 %v3508_v10, %v5172_v43  ;;  %v3511_v17 = vadd.f32 %v3510_v15, %v3509_v36  ;;  %v3575_v44 = vadd.f32 %v3574_v16, %v3573_v14 }
 0x163   :  { %v5250_v18 = vadd.f32 %v3572_v11, %v2369_v19  ;;  %v2372_v23 = vadd.f32 %v3511_v17, %v5175_v47 }
 0x165   :  { %v5253_v22 = vadd.f32 %v3575_v44, %v2372_v23  ;;  %v3512_v21 = vpop.f32.mrb[56].mxu1  ;;  %v3576_v24 = vpop.f32.mrb[56].mxu0 }
 0x166   :  { %v3513_v25 = vpop.f32.mrb[57].mxu1  ;;  %v3577_v29 = vpop.f32.mrb[57].mxu0 }
 0x167   :  { %v3514_v4 = vadd.f32 %v3513_v25, %v3512_v21  ;;  %v3578_v31 = vadd.f32 %v3577_v29, %v3576_v24  ;;  %v3515_v33 = vpop.f32.mrb[58].mxu1  ;;  %v3579_v12 = vpop.f32.mrb[58].mxu0 }
 0x168   :  { %v3516_v34 = vpop.f32.mrb[59].mxu1  ;;  %v3580_v35 = vpop.f32.mrb[59].mxu0 }
 0x169   :  { %v2377_v43 = vadd.f32 %v3514_v4, %v5190_v3  ;;  %v3517_v52 = vadd.f32 %v3516_v34, %v3515_v33  ;;  %v3581_v38 = vadd.f32 %v3580_v35, %v3579_v12 }
 0x16b   :  { %v5256_v39 = vadd.f32 %v3578_v31, %v2377_v43  ;;  %v2380_v47 = vadd.f32 %v3517_v52, %v5193_v7 }
 0x16d   :  { %v5259_v40 = vadd.f32 %v3581_v38, %v2380_v47  ;;  %v3518_v37 = vpop.f32.mrb[60].mxu1  ;;  %v3582_v41 = vpop.f32.mrb[60].mxu0 }
 0x16e   :  { %v3519_v60 = vpop.f32.mrb[61].mxu1  ;;  %v3583_v45 = vpop.f32.mrb[61].mxu0 }
 0x16f   :  { %v3520_v48 = vadd.f32 %v3519_v60, %v3518_v37  ;;  %v3584_v49 = vadd.f32 %v3583_v45, %v3582_v41  ;;  %v3521_v50 = vpop.f32.mrb[62].mxu1  ;;  %v3585_v20 = vpop.f32.mrb[62].mxu0 }
 0x170   :  { %v3522_v55 = vpop.f32.mrb[63].mxu1  ;;  %v3586_v56 = vpop.f32.mrb[63].mxu0 }
 0x171   :  { %v2385_v3 = vadd.f32 %v3520_v48, %v5208_v30  ;;  %v3523_v57 = vadd.f32 %v3522_v55, %v3521_v50  ;;  %v3587_v28 = vadd.f32 %v3586_v56, %v3585_v20 }
 0x173   :  { %v5262_v58 = vadd.f32 %v3584_v49, %v2385_v3  ;;  %v2388_v7 = vadd.f32 %v3523_v57, %v5211_v32 }
 0x175   :  { %v5265_v59 = vadd.f32 %v3587_v28, %v2388_v7  ;;  %v3524_v53 = vpop.f32.mrb[64].mxu1  ;;  %v3588_v62 = vpop.f32.mrb[64].mxu0 }
 0x176   :  { %v3525_v63 = vpop.f32.mrb[65].mxu1  ;;  %v3589_v61 = vpop.f32.mrb[65].mxu0 }
 0x177   :  { %v3526_v1 = vadd.f32 %v3525_v63, %v3524_v53  ;;  %v3590_v2 = vadd.f32 %v3589_v61, %v3588_v62  ;;  %v3527_v6 = vpop.f32.mrb[66].mxu1  ;;  %v3591_v13 = vpop.f32.mrb[66].mxu0 }
 0x178   :  { %v3528_v10 = vpop.f32.mrb[67].mxu1  ;;  %v3592_v11 = vpop.f32.mrb[67].mxu0 }
 0x179   :  { %v2393_v30 = vadd.f32 %v3526_v1, %v5220_v51  ;;  %v3529_v36 = vadd.f32 %v3528_v10, %v3527_v6  ;;  %v3593_v14 = vadd.f32 %v3592_v11, %v3591_v13 }
 0x17b   :  { %v5268_v15 = vadd.f32 %v3590_v2, %v2393_v30  ;;  %v2396_v32 = vadd.f32 %v3529_v36, %v5223_v54 }
 0x17d   :  { %v5271_v16 = vadd.f32 %v3593_v14, %v2396_v32  ;;  %v3530_v19 = vpop.f32.mrb[68].mxu1  ;;  %v3594_v17 = vpop.f32.mrb[68].mxu0 }
 0x17e   :  { %v3531_v44 = vpop.f32.mrb[69].mxu1  ;;  %v3595_v23 = vpop.f32.mrb[69].mxu0 }
 0x17f   :  { %v3532_v21 = vadd.f32 %v3531_v44, %v3530_v19  ;;  %v3596_v24 = vadd.f32 %v3595_v23, %v3594_v17  ;;  %v3533_v25 = vpop.f32.mrb[70].mxu1  ;;  %v3597_v29 = vpop.f32.mrb[70].mxu0 }
 0x180   :  { %v3534_v4 = vpop.f32.mrb[71].mxu1  ;;  %v3598_v31 = vpop.f32.mrb[71].mxu0 }
 0x181   :  { %v2401_v51 = vadd.f32 %v3532_v21, %v5226_v8  ;;  %v3535_v33 = vadd.f32 %v3534_v4, %v3533_v25  ;;  %v3599_v12 = vadd.f32 %v3598_v31, %v3597_v29 }
 0x183   :  { %v5274_v34 = vadd.f32 %v3596_v24, %v2401_v51  ;;  %v2404_v54 = vadd.f32 %v3535_v33, %v5229_v9 }
 0x185   :  { %v5277_v35 = vadd.f32 %v3599_v12, %v2404_v54  ;;  %v3536_v43 = vpop.f32.mrb[72].mxu1  ;;  %v3600_v52 = vpop.f32.mrb[72].mxu0 }
 0x186   :  { %v3537_v38 = vpop.f32.mrb[73].mxu1  ;;  %v3601_v47 = vpop.f32.mrb[73].mxu0 }
 0x187   :  { %v3538_v37 = vadd.f32 %v3537_v38, %v3536_v43  ;;  %v3602_v41 = vadd.f32 %v3601_v47, %v3600_v52  ;;  %v3539_v60 = vpop.f32.mrb[74].mxu1  ;;  %v3603_v45 = vpop.f32.mrb[74].mxu0 }
 0x188   :  { %v3540_v48 = vpop.f32.mrb[75].mxu1  ;;  %v3604_v49 = vpop.f32.mrb[75].mxu0 }
 0x189   :  { %v2409_v8 = vadd.f32 %v3538_v37, %v5232_v26  ;;  %v3541_v50 = vadd.f32 %v3540_v48, %v3539_v60  ;;  %v3605_v20 = vadd.f32 %v3604_v49, %v3603_v45 }
 0x18b   :  { %v5280_v55 = vadd.f32 %v3602_v41, %v2409_v8  ;;  %v2412_v9 = vadd.f32 %v3541_v50, %v5235_v27 }
 0x18d   :  { %v5283_v56 = vadd.f32 %v3605_v20, %v2412_v9  ;;  %v3542_v3 = vpop.f32.mrb[76].mxu1  ;;  %v3606_v57 = vpop.f32.mrb[76].mxu0 }
 0x18e   :  { %v3543_v28 = vpop.f32.mrb[77].mxu1  ;;  %v3607_v7 = vpop.f32.mrb[77].mxu0 }
 0x18f   :  { %v3544_v53 = vadd.f32 %v3543_v28, %v3542_v3  ;;  %v3608_v62 = vadd.f32 %v3607_v7, %v3606_v57  ;;  %v3545_v63 = vpop.f32.mrb[78].mxu1  ;;  %v3609_v61 = vpop.f32.mrb[78].mxu0 }
 0x190   :  { %v3546_v1 = vpop.f32.mrb[79].mxu1  ;;  %v3610_v2 = vpop.f32.mrb[79].mxu0 }
 0x191   :  { %v2417_v26 = vadd.f32 %v3544_v53, %v5238_v42  ;;  %v3547_v6 = vadd.f32 %v3546_v1, %v3545_v63  ;;  %v3611_v13 = vadd.f32 %v3610_v2, %v3609_v61 }
 0x193   :  { %v5286_v10 = vadd.f32 %v3608_v62, %v2417_v26  ;;  %v2420_v27 = vadd.f32 %v3547_v6, %v5241_v46 }
 0x195   :  { %v5289_v11 = vadd.f32 %v3611_v13, %v2420_v27  ;;  %v3628_v30 = vpop.f32.mrb[80].mxu1  ;;  %v3692_v36 = vpop.f32.mrb[80].mxu0 }
 0x196   :  { %v3629_v14 = vpop.f32.mrb[81].mxu1  ;;  %v3693_v32 = vpop.f32.mrb[81].mxu0 }
 0x197   :  { %v3630_v19 = vadd.f32 %v3629_v14, %v3628_v30  ;;  %v3694_v17 = vadd.f32 %v3693_v32, %v3692_v36  ;;  %v3631_v44 = vpop.f32.mrb[82].mxu1  ;;  %v3695_v23 = vpop.f32.mrb[82].mxu0 }
 0x198   :  { %v3632_v21 = vpop.f32.mrb[83].mxu1  ;;  %v3696_v24 = vpop.f32.mrb[83].mxu0 }
 0x199   :  { %v2555_v42 = vadd.f32 %v3630_v19, %v5244_v0  ;;  %v3633_v25 = vadd.f32 %v3632_v21, %v3631_v44  ;;  %v3697_v29 = vadd.f32 %v3696_v24, %v3695_v23 }
 0x19b   :  { %v5292_v4 = vadd.f32 %v3694_v17, %v2555_v42  ;;  %v2558_v46 = vadd.f32 %v3633_v25, %v5247_v5 }
 0x19d   :  { %v5295_v31 = vadd.f32 %v3697_v29, %v2558_v46  ;;  %v3634_v51 = vpop.f32.mrb[84].mxu1  ;;  %v3698_v33 = vpop.f32.mrb[84].mxu0 }
 0x19e   :  { %v3635_v12 = vpop.f32.mrb[85].mxu1  ;;  %v3699_v54 = vpop.f32.mrb[85].mxu0 }
 0x19f   :  { %v3636_v43 = vadd.f32 %v3635_v12, %v3634_v51  ;;  %v3700_v52 = vadd.f32 %v3699_v54, %v3698_v33  ;;  %v3637_v38 = vpop.f32.mrb[86].mxu1  ;;  %v3701_v47 = vpop.f32.mrb[86].mxu0 }
 0x1a0   :  { %v3638_v37 = vpop.f32.mrb[87].mxu1  ;;  %v3702_v41 = vpop.f32.mrb[87].mxu0 }
 0x1a1   :  { %v2563_v0 = vadd.f32 %v3636_v43, %v5250_v18  ;;  %v3639_v60 = vadd.f32 %v3638_v37, %v3637_v38  ;;  %v3703_v45 = vadd.f32 %v3702_v41, %v3701_v47 }
 0x1a3   :  { %v5298_v48 = vadd.f32 %v3700_v52, %v2563_v0  ;;  %v2566_v5 = vadd.f32 %v3639_v60, %v5253_v22 }
 0x1a5   :  { %v5301_v49 = vadd.f32 %v3703_v45, %v2566_v5  ;;  %v3640_v8 = vpop.f32.mrb[88].mxu1  ;;  %v3704_v50 = vpop.f32.mrb[88].mxu0 }
 0x1a6   :  { %v3641_v20 = vpop.f32.mrb[89].mxu1  ;;  %v3705_v9 = vpop.f32.mrb[89].mxu0 }
 0x1a7   :  { %v3642_v3 = vadd.f32 %v3641_v20, %v3640_v8  ;;  %v3706_v57 = vadd.f32 %v3705_v9, %v3704_v50  ;;  %v3643_v28 = vpop.f32.mrb[90].mxu1  ;;  %v3707_v7 = vpop.f32.mrb[90].mxu0 }
 0x1a8   :  { %v3644_v53 = vpop.f32.mrb[91].mxu1  ;;  %v3708_v62 = vpop.f32.mrb[91].mxu0 }
 0x1a9   :  { %v2571_v18 = vadd.f32 %v3642_v3, %v5256_v39  ;;  %v3645_v63 = vadd.f32 %v3644_v53, %v3643_v28  ;;  %v3709_v61 = vadd.f32 %v3708_v62, %v3707_v7 }
 0x1ab   :  { %v5304_v1 = vadd.f32 %v3706_v57, %v2571_v18  ;;  %v2574_v22 = vadd.f32 %v3645_v63, %v5259_v40 }
 0x1ad   :  { %v5307_v2 = vadd.f32 %v3709_v61, %v2574_v22  ;;  %v3646_v26 = vpop.f32.mrb[92].mxu1  ;;  %v3710_v6 = vpop.f32.mrb[92].mxu0 }
 0x1ae   :  { %v3647_v13 = vpop.f32.mrb[93].mxu1  ;;  %v3711_v27 = vpop.f32.mrb[93].mxu0 }
 0x1af   :  { %v3648_v30 = vadd.f32 %v3647_v13, %v3646_v26  ;;  %v3712_v36 = vadd.f32 %v3711_v27, %v3710_v6  ;;  %v3649_v14 = vpop.f32.mrb[94].mxu1  ;;  %v3713_v32 = vpop.f32.mrb[94].mxu0 }
 0x1b0   :  { %v3650_v19 = vpop.f32.mrb[95].mxu1  ;;  %v3714_v17 = vpop.f32.mrb[95].mxu0 }
 0x1b1   :  { %v2579_v39 = vadd.f32 %v3648_v30, %v5262_v58  ;;  %v3651_v44 = vadd.f32 %v3650_v19, %v3649_v14  ;;  %v3715_v23 = vadd.f32 %v3714_v17, %v3713_v32 }
 0x1b3   :  { %v5310_v21 = vadd.f32 %v3712_v36, %v2579_v39  ;;  %v2582_v40 = vadd.f32 %v3651_v44, %v5265_v59 }
 0x1b5   :  { %v5313_v24 = vadd.f32 %v3715_v23, %v2582_v40  ;;  %v3652_v42 = vpop.f32.mrb[96].mxu1  ;;  %v3716_v25 = vpop.f32.mrb[96].mxu0 }
 0x1b6   :  { %v3653_v29 = vpop.f32.mrb[97].mxu1  ;;  %v3717_v46 = vpop.f32.mrb[97].mxu0 }
 0x1b7   :  { %v3654_v51 = vadd.f32 %v3653_v29, %v3652_v42  ;;  %v3718_v33 = vadd.f32 %v3717_v46, %v3716_v25  ;;  %v3655_v12 = vpop.f32.mrb[98].mxu1  ;;  %v3719_v54 = vpop.f32.mrb[98].mxu0 }
 0x1b8   :  { %v3656_v43 = vpop.f32.mrb[99].mxu1  ;;  %v3720_v52 = vpop.f32.mrb[99].mxu0 }
 0x1b9   :  { %v2587_v58 = vadd.f32 %v3654_v51, %v5268_v15  ;;  %v3657_v38 = vadd.f32 %v3656_v43, %v3655_v12  ;;  %v3721_v47 = vadd.f32 %v3720_v52, %v3719_v54 }
 0x1bb   :  { %v5316_v37 = vadd.f32 %v3718_v33, %v2587_v58  ;;  %v2590_v59 = vadd.f32 %v3657_v38, %v5271_v16 }
 0x1bd   :  { %v5319_v41 = vadd.f32 %v3721_v47, %v2590_v59  ;;  %v3658_v0 = vpop.f32.mrb[100].mxu1  ;;  %v3722_v60 = vpop.f32.mrb[100].mxu0 }
 0x1be   :  { %v3659_v45 = vpop.f32.mrb[101].mxu1  ;;  %v3723_v5 = vpop.f32.mrb[101].mxu0 }
 0x1bf   :  { %v3660_v8 = vadd.f32 %v3659_v45, %v3658_v0  ;;  %v3724_v50 = vadd.f32 %v3723_v5, %v3722_v60  ;;  %v3661_v20 = vpop.f32.mrb[102].mxu1  ;;  %v3725_v9 = vpop.f32.mrb[102].mxu0 }
 0x1c0   :  { %v3662_v3 = vpop.f32.mrb[103].mxu1  ;;  %v3726_v57 = vpop.f32.mrb[103].mxu0 }
 0x1c1   :  { %v2595_v15 = vadd.f32 %v3660_v8, %v5274_v34  ;;  %v3663_v28 = vadd.f32 %v3662_v3, %v3661_v20  ;;  %v3727_v7 = vadd.f32 %v3726_v57, %v3725_v9 }
 0x1c3   :  { %v5322_v53 = vadd.f32 %v3724_v50, %v2595_v15  ;;  %v2598_v16 = vadd.f32 %v3663_v28, %v5277_v35  ;;  %v5349_v15 = vld [vmem:[%s5412_s3] ss:$0 sm:$0xff] }
 0x1c5   :  { %v5325_v62 = vadd.f32 %v3727_v7, %v2598_v16  ;;  %v3664_v18 = vpop.f32.mrb[104].mxu1  ;;  %v3728_v63 = vpop.f32.mrb[104].mxu0 }
 0x1c6   :  { %v3665_v61 = vpop.f32.mrb[105].mxu1  ;;  %v3729_v22 = vpop.f32.mrb[105].mxu0 }
 0x1c7   :  { %v3666_v26 = vadd.f32 %v3665_v61, %v3664_v18  ;;  %v3730_v6 = vadd.f32 %v3729_v22, %v3728_v63  ;;  %v3667_v13 = vpop.f32.mrb[106].mxu1  ;;  %v3731_v27 = vpop.f32.mrb[106].mxu0 }
 0x1c8   :  { %v3668_v30 = vpop.f32.mrb[107].mxu1  ;;  %v3732_v36 = vpop.f32.mrb[107].mxu0 }
 0x1c9   :  { %v2603_v34 = vadd.f32 %v3666_v26, %v5280_v55  ;;  %v3669_v14 = vadd.f32 %v3668_v30, %v3667_v13  ;;  %v3733_v32 = vadd.f32 %v3732_v36, %v3731_v27 }
 0x1cb   :  { %v5328_v19 = vadd.f32 %v3730_v6, %v2603_v34  ;;  %v2606_v35 = vadd.f32 %v3669_v14, %v5283_v56 }
 0x1cd   :  { %v5331_v17 = vadd.f32 %v3733_v32, %v2606_v35  ;;  %v3670_v39 = vpop.f32.mrb[108].mxu1  ;;  %v3734_v44 = vpop.f32.mrb[108].mxu0 }
 0x1ce   :  { %v3671_v23 = vpop.f32.mrb[109].mxu1  ;;  %v3735_v40 = vpop.f32.mrb[109].mxu0 }
 0x1cf   :  { %v3672_v42 = vadd.f32 %v3671_v23, %v3670_v39  ;;  %v3736_v25 = vadd.f32 %v3735_v40, %v3734_v44  ;;  %v3673_v29 = vpop.f32.mrb[110].mxu1  ;;  %v3737_v46 = vpop.f32.mrb[110].mxu0 }
 0x1d0   :  { %v3674_v51 = vpop.f32.mrb[111].mxu1  ;;  %v3738_v33 = vpop.f32.mrb[111].mxu0 }
 0x1d1   :  { %v2611_v55 = vadd.f32 %v3672_v42, %v5286_v10  ;;  %v3675_v12 = vadd.f32 %v3674_v51, %v3673_v29  ;;  %v3739_v54 = vadd.f32 %v3738_v33, %v3737_v46 }
 0x1d3   :  { %v5334_v43 = vadd.f32 %v3736_v25, %v2611_v55  ;;  %v2614_v56 = vadd.f32 %v3675_v12, %v5289_v11  ;;  %v5343_v11 = vld [vmem:[%s5411_s2] ss:$0 sm:$0xff]  ;;  %s4271_s2 = smov [#allocation2]  }
 0x1d4   :  { %s2991_s3 = sshll.u32 %s4271_s2, 4  ;;  %s2992_s3 = int_to_ptr.vmem [resolvable:$true] %s2991_s3 }
 0x1d5   :  { %v5337_v52 = vadd.f32 %v3739_v54, %v2614_v56  ;;  %v3756_v58 = vpop.f32.mrb[112].mxu1  ;;  %v3820_v38 = vpop.f32.mrb[112].mxu0  ;;  %s4247_s18 = scalar_lea.vmem %s2992_s3, 2048  ;;  %p4252_p1 = scmp.lt.s32.totalorder %s2992_s3, %s2992_s3 }
 0x1d6   :  { %v3757_v47 = vpop.f32.mrb[113].mxu1  ;;  %v3821_v59 = vpop.f32.mrb[113].mxu0  ;;  %p4248_p0 = scmp.ne.s32.totalorder %s2992_s3, %s4247_s18  ;;  %p4253_p2 = scmp.lt.s32.totalorder %s4247_s18, %s4247_s18 }
 0x1d7   :  { %v3758_v0 = vadd.f32 %v3757_v47, %v3756_v58  ;;  %v3822_v60 = vadd.f32 %v3821_v59, %v3820_v38  ;;  %v3759_v45 = vpop.f32.mrb[114].mxu1  ;;  %v3823_v5 = vpop.f32.mrb[114].mxu0 }
 0x1d8   :  { %v3760_v8 = vpop.f32.mrb[115].mxu1  ;;  %v3824_v50 = vpop.f32.mrb[115].mxu0  ;;  %p4254_p3 = por %p4253_p2, %p4252_p1 }
 0x1d9   :  { %v2749_v10 = vadd.f32 %v3758_v0, %v5292_v4  ;;  %v3761_v20 = vadd.f32 %v3760_v8, %v3759_v45  ;;  %v3825_v9 = vadd.f32 %v3824_v50, %v3823_v5 }
 0x1da   :  { %p4255_p4 = pnand %p4254_p3, %p4248_p0 }
 0x1db   :  { %v2846_v3 = vadd.f32 %v3822_v60, %v2749_v10  ;;  %v2752_v57 = vadd.f32 %v3761_v20, %v5295_v31 }
 0x1dd   :  { %v2915_v28 = vmul.f32 %v5343_v11, %v2846_v3  ;;  %v2849_v7 = vadd.f32 %v3825_v9, %v2752_v57  ;;  %v3762_v16 = vpop.f32.mrb[116].mxu1  ;;  %v3826_v4 = vpop.f32.mrb[116].mxu0 }
 0x1de   :  { %v3763_v18 = vpop.f32.mrb[117].mxu1  ;;  %v3827_v63 = vpop.f32.mrb[117].mxu0 }
 0x1df   :  { %v2938_v61 = vadd.f32 %v5349_v15, %v2915_v28  ;;  %v2916_v22 = vmul.f32 %v5343_v11, %v2849_v7  ;;  %v3764_v26 = vadd.f32 %v3763_v18, %v3762_v16  ;;  %v3828_v6 = vadd.f32 %v3827_v63, %v3826_v4  ;;  %v3765_v13 = vpop.f32.mrb[118].mxu1  ;;  %v3829_v31 = vpop.f32.mrb[118].mxu0 }
 0x1e0   :  { %v3766_v27 = vpop.f32.mrb[119].mxu1  ;;  %v3830_v30 = vpop.f32.mrb[119].mxu0 }
 0x1e1   :  { %v2954_v36 = vmax.f32 %v2938_v61, 0.0  ;;  %v2939_v34 = vadd.f32 %v5349_v15, %v2916_v22  ;;  %v2757_v14 = vadd.f32 %v3764_v26, %v5298_v48  ;;  %v3767_v32 = vadd.f32 %v3766_v27, %v3765_v13 }
 0x1e2   :  { %v3831_v35 = vadd.f32 %v3830_v30, %v3829_v31 }
 0x1e3   :  { %2970 = vst [vmem:[#allocation2] sm:$0xff] %v2954_v36  ;;  %v2955_v39 = vmax.f32 %v2939_v34, 0.0  ;;  %v2854_v44 = vadd.f32 %v3828_v6, %v2757_v14  ;;  %v2760_v23 = vadd.f32 %v3767_v32, %v5301_v49 }
 0x1e5   :  { %2971 = vst [vmem:[#allocation2 + $0x8] sm:$0xff] %v2955_v39  ;;  %v2917_v40 = vmul.f32 %v5343_v11, %v2854_v44  ;;  %v2857_v42 = vadd.f32 %v3831_v35, %v2760_v23  ;;  %v3768_v25 = vpop.f32.mrb[120].mxu1  ;;  %v3832_v29 = vpop.f32.mrb[120].mxu0 }
 0x1e6   :  { %v3769_v46 = vpop.f32.mrb[121].mxu1  ;;  %v3833_v51 = vpop.f32.mrb[121].mxu0 }
 0x1e7   :  { %v2940_v33 = vadd.f32 %v5349_v15, %v2917_v40  ;;  %v2918_v55 = vmul.f32 %v5343_v11, %v2857_v42  ;;  %v3770_v48 = vadd.f32 %v3769_v46, %v3768_v25  ;;  %v3834_v12 = vadd.f32 %v3833_v51, %v3832_v29  ;;  %v3771_v54 = vpop.f32.mrb[122].mxu1  ;;  %v3835_v56 = vpop.f32.mrb[122].mxu0 }
 0x1e8   :  { %v3772_v58 = vpop.f32.mrb[123].mxu1  ;;  %v3836_v38 = vpop.f32.mrb[123].mxu0 }
 0x1e9   :  { %v2956_v47 = vmax.f32 %v2940_v33, 0.0  ;;  %v2941_v49 = vadd.f32 %v5349_v15, %v2918_v55  ;;  %v2765_v59 = vadd.f32 %v3770_v48, %v5304_v1  ;;  %v3773_v0 = vadd.f32 %v3772_v58, %v3771_v54 }
 0x1ea   :  { %v3837_v60 = vadd.f32 %v3836_v38, %v3835_v56 }
 0x1eb   :  { %2972 = vst [vmem:[#allocation2 + $0x10] sm:$0xff] %v2956_v47  ;;  %v2957_v45 = vmax.f32 %v2941_v49, 0.0  ;;  %v2862_v5 = vadd.f32 %v3834_v12, %v2765_v59  ;;  %v2768_v8 = vadd.f32 %v3773_v0, %v5307_v2 }
 0x1ed   :  { %2973 = vst [vmem:[#allocation2 + $0x18] sm:$0xff] %v2957_v45  ;;  %v2919_v50 = vmul.f32 %v5343_v11, %v2862_v5  ;;  %v2865_v10 = vadd.f32 %v3837_v60, %v2768_v8  ;;  %v3774_v20 = vpop.f32.mrb[124].mxu1  ;;  %v3838_v9 = vpop.f32.mrb[124].mxu0 }
 0x1ee   :  { %v3775_v3 = vpop.f32.mrb[125].mxu1  ;;  %v3839_v57 = vpop.f32.mrb[125].mxu0 }
 0x1ef   :  { %v2942_v28 = vadd.f32 %v5349_v15, %v2919_v50  ;;  %v2920_v7 = vmul.f32 %v5343_v11, %v2865_v10  ;;  %v3776_v1 = vadd.f32 %v3775_v3, %v3774_v20  ;;  %v3840_v16 = vadd.f32 %v3839_v57, %v3838_v9  ;;  %v3777_v4 = vpop.f32.mrb[126].mxu1  ;;  %v3841_v18 = vpop.f32.mrb[126].mxu0 }
 0x1f0   :  { %v3778_v63 = vpop.f32.mrb[127].mxu1  ;;  %v3842_v61 = vpop.f32.mrb[127].mxu0 }
 0x1f1   :  { %v2958_v22 = vmax.f32 %v2942_v28, 0.0  ;;  %v2943_v2 = vadd.f32 %v5349_v15, %v2920_v7  ;;  %v2773_v26 = vadd.f32 %v3776_v1, %v5310_v21  ;;  %v3779_v6 = vadd.f32 %v3778_v63, %v3777_v4 }
 0x1f2   :  { %v3843_v13 = vadd.f32 %v3842_v61, %v3841_v18 }
 0x1f3   :  { %2974 = vst [vmem:[#allocation2 + $0x20] sm:$0xff] %v2958_v22  ;;  %v2959_v31 = vmax.f32 %v2943_v2, 0.0  ;;  %v2870_v27 = vadd.f32 %v3840_v16, %v2773_v26  ;;  %v2776_v30 = vadd.f32 %v3779_v6, %v5313_v24 }
 0x1f5   :  { %2975 = vst [vmem:[#allocation2 + $0x28] sm:$0xff] %v2959_v31  ;;  %v2921_v36 = vmul.f32 %v5343_v11, %v2870_v27  ;;  %v2873_v34 = vadd.f32 %v3843_v13, %v2776_v30  ;;  %v3780_v14 = vpop.f32.mrb[128].mxu1  ;;  %v3844_v32 = vpop.f32.mrb[128].mxu0 }
 0x1f6   :  { %v3781_v35 = vpop.f32.mrb[129].mxu1  ;;  %v3845_v39 = vpop.f32.mrb[129].mxu0 }
 0x1f7   :  { %v2944_v44 = vadd.f32 %v5349_v15, %v2921_v36  ;;  %v2922_v23 = vmul.f32 %v5343_v11, %v2873_v34  ;;  %v3782_v21 = vadd.f32 %v3781_v35, %v3780_v14  ;;  %v3846_v40 = vadd.f32 %v3845_v39, %v3844_v32  ;;  %v3783_v42 = vpop.f32.mrb[130].mxu1  ;;  %v3847_v25 = vpop.f32.mrb[130].mxu0 }
 0x1f8   :  { %v3784_v29 = vpop.f32.mrb[131].mxu1  ;;  %v3848_v46 = vpop.f32.mrb[131].mxu0 }
 0x1f9   :  { %v2960_v51 = vmax.f32 %v2944_v44, 0.0  ;;  %v2945_v24 = vadd.f32 %v5349_v15, %v2922_v23  ;;  %v2781_v33 = vadd.f32 %v3782_v21, %v5316_v37  ;;  %v3785_v55 = vadd.f32 %v3784_v29, %v3783_v42 }
 0x1fa   :  { %v3849_v48 = vadd.f32 %v3848_v46, %v3847_v25 }
 0x1fb   :  { %2976 = vst [vmem:[#allocation2 + $0x30] sm:$0xff] %v2960_v51  ;;  %v2961_v12 = vmax.f32 %v2945_v24, 0.0  ;;  %v2878_v54 = vadd.f32 %v3846_v40, %v2781_v33  ;;  %v2784_v56 = vadd.f32 %v3785_v55, %v5319_v41 }
 0x1fd   :  { %2977 = vst [vmem:[#allocation2 + $0x38] sm:$0xff] %v2961_v12  ;;  %v2923_v58 = vmul.f32 %v5343_v11, %v2878_v54  ;;  %v2881_v38 = vadd.f32 %v3849_v48, %v2784_v56  ;;  %v3786_v47 = vpop.f32.mrb[132].mxu1  ;;  %v3850_v49 = vpop.f32.mrb[132].mxu0 }
 0x1fe   :  { %v3787_v59 = vpop.f32.mrb[133].mxu1  ;;  %v3851_v0 = vpop.f32.mrb[133].mxu0 }
 0x1ff   :  { %v2946_v60 = vadd.f32 %v5349_v15, %v2923_v58  ;;  %v2924_v45 = vmul.f32 %v5343_v11, %v2881_v38  ;;  %v3788_v37 = vadd.f32 %v3787_v59, %v3786_v47  ;;  %v3852_v5 = vadd.f32 %v3851_v0, %v3850_v49  ;;  %v3789_v8 = vpop.f32.mrb[134].mxu1  ;;  %v3853_v50 = vpop.f32.mrb[134].mxu0 }
 0x200   :  { %v3790_v10 = vpop.f32.mrb[135].mxu1  ;;  %v3854_v20 = vpop.f32.mrb[135].mxu0 }
 0x201   :  { %v2962_v9 = vmax.f32 %v2946_v60, 0.0  ;;  %v2947_v41 = vadd.f32 %v5349_v15, %v2924_v45  ;;  %v2789_v3 = vadd.f32 %v3788_v37, %v5322_v53  ;;  %v3791_v57 = vadd.f32 %v3790_v10, %v3789_v8 }
 0x202   :  { %v3855_v28 = vadd.f32 %v3854_v20, %v3853_v50 }
 0x203   :  { %2978 = vst [vmem:[#allocation2 + $0x40] sm:$0xff] %v2962_v9  ;;  %v2963_v7 = vmax.f32 %v2947_v41, 0.0  ;;  %v2886_v1 = vadd.f32 %v3852_v5, %v2789_v3  ;;  %v2792_v16 = vadd.f32 %v3791_v57, %v5325_v62 }
 0x205   :  { %2979 = vst [vmem:[#allocation2 + $0x48] sm:$0xff] %v2963_v7  ;;  %v2925_v4 = vmul.f32 %v5343_v11, %v2886_v1  ;;  %v2889_v18 = vadd.f32 %v3855_v28, %v2792_v16  ;;  %v3792_v63 = vpop.f32.mrb[136].mxu1  ;;  %v3856_v61 = vpop.f32.mrb[136].mxu0 }
 0x206   :  { %v3793_v22 = vpop.f32.mrb[137].mxu1  ;;  %v3857_v2 = vpop.f32.mrb[137].mxu0 }
 0x207   :  { %v2948_v26 = vadd.f32 %v5349_v15, %v2925_v4  ;;  %v2926_v6 = vmul.f32 %v5343_v11, %v2889_v18  ;;  %v3794_v53 = vadd.f32 %v3793_v22, %v3792_v63  ;;  %v3858_v13 = vadd.f32 %v3857_v2, %v3856_v61  ;;  %v3795_v31 = vpop.f32.mrb[138].mxu1  ;;  %v3859_v27 = vpop.f32.mrb[138].mxu0 }
 0x208   :  { %v3796_v30 = vpop.f32.mrb[139].mxu1  ;;  %v3860_v36 = vpop.f32.mrb[139].mxu0 }
 0x209   :  { %v2964_v34 = vmax.f32 %v2948_v26, 0.0  ;;  %v2949_v62 = vadd.f32 %v5349_v15, %v2926_v6  ;;  %v2797_v14 = vadd.f32 %v3794_v53, %v5328_v19  ;;  %v3797_v32 = vadd.f32 %v3796_v30, %v3795_v31 }
 0x20a   :  { %v3861_v35 = vadd.f32 %v3860_v36, %v3859_v27 }
 0x20b   :  { %2980 = vst [vmem:[#allocation2 + $0x50] sm:$0xff] %v2964_v34  ;;  %v2965_v39 = vmax.f32 %v2949_v62, 0.0  ;;  %v2894_v44 = vadd.f32 %v3858_v13, %v2797_v14  ;;  %v2800_v23 = vadd.f32 %v3797_v32, %v5331_v17 }
 0x20d   :  { %2981 = vst [vmem:[#allocation2 + $0x58] sm:$0xff] %v2965_v39  ;;  %v2927_v21 = vmul.f32 %v5343_v11, %v2894_v44  ;;  %v2897_v40 = vadd.f32 %v3861_v35, %v2800_v23  ;;  %v3798_v42 = vpop.f32.mrb[140].mxu1  ;;  %v3862_v25 = vpop.f32.mrb[140].mxu0 }
 0x20e   :  { %v3799_v29 = vpop.f32.mrb[141].mxu1  ;;  %v3863_v46 = vpop.f32.mrb[141].mxu0 }
 0x20f   :  { %v2950_v51 = vadd.f32 %v5349_v15, %v2927_v21  ;;  %v2928_v24 = vmul.f32 %v5343_v11, %v2897_v40  ;;  %v3800_v19 = vadd.f32 %v3799_v29, %v3798_v42  ;;  %v3864_v33 = vadd.f32 %v3863_v46, %v3862_v25  ;;  %v3801_v55 = vpop.f32.mrb[142].mxu1  ;;  %v3865_v48 = vpop.f32.mrb[142].mxu0 }
 0x210   :  { %v3802_v12 = vpop.f32.mrb[143].mxu1  ;;  %v3866_v54 = vpop.f32.mrb[143].mxu0 }
 0x211   :  { %v2966_v56 = vmax.f32 %v2950_v51, 0.0  ;;  %v2951_v17 = vadd.f32 %v5349_v15, %v2928_v24  ;;  %v2805_v58 = vadd.f32 %v3800_v19, %v5334_v43  ;;  %v3803_v38 = vadd.f32 %v3802_v12, %v3801_v55 }
 0x212   :  { %v3867_v47 = vadd.f32 %v3866_v54, %v3865_v48 }
 0x213   :  { %2982 = vst [vmem:[#allocation2 + $0x60] sm:$0xff] %v2966_v56  ;;  %v2967_v49 = vmax.f32 %v2951_v17, 0.0  ;;  %v2902_v59 = vadd.f32 %v3864_v33, %v2805_v58  ;;  %v2808_v0 = vadd.f32 %v3803_v38, %v5337_v52 }
 0x215   :  { %2983 = vst [vmem:[#allocation2 + $0x68] sm:$0xff] %v2967_v49  ;;  %v2929_v60 = vmul.f32 %v5343_v11, %v2902_v59  ;;  %v2905_v45 = vadd.f32 %v3867_v47, %v2808_v0 }
 0x217   :  { %v2952_v37 = vadd.f32 %v5349_v15, %v2929_v60  ;;  %v2930_v5 = vmul.f32 %v5343_v11, %v2905_v45 }
 0x219   :  { %v2968_v8 = vmax.f32 %v2952_v37, 0.0  ;;  %v2953_v43 = vadd.f32 %v5349_v15, %v2930_v5 }
 0x21b   :  { %2984 = vst [vmem:[#allocation2 + $0x70] sm:$0xff] %v2968_v8  ;;  %v2969_v50 = vmax.f32 %v2953_v43, 0.0 }
 0x21d   :  { %2985 = vst [vmem:[#allocation2 + $0x78] sm:$0xff] %v2969_v50 }
 0x21e   :  { %4258 = shalt.err (!%p4255_p4)
}
 0x21f   :  { %s4259_s21 = scalar_lea.hbm %s5413_s4, 2048 }
 0x220   :  { %p4260_p5 = scmp.ne.s32.totalorder %s5413_s4, %s4259_s21  ;;  %p4263_p6 = scmp.lt.u32.totalorder %s4259_s21, %s5413_s4 }
 0x222   :  { %p4265_p7 = pnand %p4263_p6, %p4260_p5 }
 0x224   :  { %4268 = shalt.err (!%p4265_p7)
}
 0x225   :  { %s4272_s26 = smov 128   ;;  %s4273_s27 = smov 8  }
 0x226   :  { %2997 = dma.vmem_to_hbm [thread:$0]  %s2992_s3, 2048, %s5413_s4, [#allocation3], %s4272_s26, %s4272_s26, %s4273_s27  }
 0x227   :  { %4269 = dma.done.wait [#allocation3], 2048  }
 0x228   :  { %4270 = vsyncadd [#allocation3], 4294965248 }
 0x229   :  { %3001 = vsyncpa [#allocation3], 1 }

</bundles_post_ra>
